<compile_context>
chip_gen: v6e
topology: v6e:2x2x1
jax: 0.10.0
libtpu: 0.0.40
codegen_flags: <defaults>
</compile_context>

<pallas_src>
import functools

import numpy as np

import jax
import jax.numpy as jnp
from jax.experimental import pallas as pl
from jax.experimental.pallas import tpu as pltpu


# ----------------------------------------------------------------------------
# Constant selection matrix: avgpool(2,2) on the 8x8 conv1 map fused with the
# im2col of the 2x2/stride-2 conv2.  Row (tap*4 + q) picks (with weight 0.25)
# the four conv1 pixels that average into pooled pixel (2*qy+i, 2*qx+j), where
# tap = i*2 + j and q = qy*2 + qx.
# ----------------------------------------------------------------------------
def _build_pool_tap_select():
    g = np.zeros((16, 64), np.float32)
    for t, (i, j) in enumerate([(0, 0), (0, 1), (1, 0), (1, 1)]):
        for q, (qy, qx) in enumerate([(0, 0), (0, 1), (1, 0), (1, 1)]):
            py, px = 2 * qy + i, 2 * qx + j          # position in the 4x4 pooled map
            for a in range(2):
                for b in range(2):
                    g[t * 4 + q, (2 * py + a) * 8 + (2 * px + b)] = 0.25
    return g


_POOL1_TAP_SELECT = _build_pool_tap_select()


# ----------------------------------------------------------------------------
# The fused Pallas kernel (one grid step == one batch sample)
# ----------------------------------------------------------------------------
def _fused_cnn_kernel(x_ref, w1_ref, b1_ref, w2_ref, b2_ref,
                      wc1_ref, bc1_ref, g_ref, wc2_ref, bc2_ref,
                      wf1_ref, bf1_ref, wf2_ref, bf2_ref, wf3_ref, bf3_ref,
                      aff_ref, o_ref, *, restrict_output):
    f32 = jnp.float32
    relu = lambda v: jnp.maximum(v, 0.0)

    # ---- per-pixel 1x1 chain: (embedding + concat + dim_red_1) folded into w1,
    #      then dim_red_2.  x: (100, Cin), channels on lanes.
    x = x_ref[0]
    h = relu(jnp.dot(x, w1_ref[...], preferred_element_type=f32) + b1_ref[...])
    h = relu(jnp.dot(h, w2_ref[...], preferred_element_type=f32) + b2_ref[...])  # (100, rc)

    rc = w2_ref.shape[1]        # reduced_channels (20)
    c1n = wc1_ref.shape[1]      # conv1 out channels (64)
    c2n = wc2_ref.shape[1]      # conv2 out channels (128)

    # ---- conv1: 3x3 valid on the 10x10 map -> 8x8, as 9 tap-accumulated GEMMs.
    # shifted[dx][y*8 + x, :] == h[y*10 + (x + dx), :]
    shifted = [
        jnp.concatenate([h[r * 10 + dx: r * 10 + dx + 8, :] for r in range(10)], axis=0)
        for dx in range(3)
    ]                                                       # each (80, rc)
    acc = jnp.zeros((64, c1n), f32)
    for dy in range(3):
        for dx in range(3):
            tap = shifted[dx][8 * dy: 8 * dy + 64, :]       # (64, rc), rows = y*8 + x
            wt = wc1_ref[rc * (3 * dy + dx): rc * (3 * dy + dx + 1), :]
            acc = acc + jnp.dot(tap, wt, preferred_element_type=f32)
    c1 = relu(acc + bc1_ref[...])                           # (64, 64) rows = y*8 + x

    # ---- avgpool(2,2) fused with conv2's (2x2, stride 2) im2col: one selection matmul.
    t = jnp.dot(g_ref[...], c1, preferred_element_type=f32)  # (16, c1n), rows = tap*4 + q
    acc2 = jnp.zeros((4, c2n), f32)
    for k in range(4):                                       # conv2 taps
        acc2 = acc2 + jnp.dot(t[4 * k: 4 * k + 4, :],
                              wc2_ref[c1n * k: c1n * (k + 1), :],
                              preferred_element_type=f32)
    c2 = relu(acc2 + bc2_ref[...])                           # (4, 128), rows = qy*2 + qx

    # ---- avgpool(2,2) on the 2x2 map -> 1x1 spatial, i.e. flatten to (1, 128)
    feat = jnp.sum(c2, axis=0, keepdims=True) * 0.25         # (1, 128)

    # ---- fully-connected head
    y = relu(jnp.dot(feat, wf1_ref[...], preferred_element_type=f32) + bf1_ref[...])
    y = relu(jnp.dot(y, wf2_ref[...], preferred_element_type=f32) + bf2_ref[...])
    y = jnp.dot(y, wf3_ref[...], preferred_element_type=f32) + bf3_ref[...]   # (1, out)

    if restrict_output:
        scale = aff_ref[0:1, 0:1]
        mean = aff_ref[0:1, 1:2]
        y = jnp.tanh(y) * scale + mean

    o_ref[0] = y.astype(o_ref.dtype)


# ----------------------------------------------------------------------------
# Wrapper: layout plumbing + the single pallas_call
# ----------------------------------------------------------------------------
def simple_cnn_small_forward(x_nchw, fused_weights, out_affine, *, restrict_output=True):
    """x_nchw: (N, Cin, 10, 10) f32  ->  (N, output_dim) f32."""
    N, Cin, H, W = x_nchw.shape
    assert (H, W) == (10, 10), "fc head expects 128*1*1 features => 10x10 spatial input"

    # Layout plumbing only: NCHW -> per-sample (H*W, Cin) pixel matrix.
    x2d = jnp.transpose(x_nchw, (0, 2, 3, 1)).reshape(N, H * W, Cin).astype(jnp.float32)

    names = ("w1", "b1", "w2", "b2", "wc1", "bc1", "g", "wc2", "bc2",
             "wf1", "bf1", "wf2", "bf2", "wf3", "bf3")
    weights = [fused_weights[k] for k in names]
    out_dim = fused_weights["wf3"].shape[1]

    kernel = functools.partial(_fused_cnn_kernel, restrict_output=restrict_output)

    in_specs = [pl.BlockSpec((1, H * W, Cin), lambda n: (n, 0, 0))]
    in_specs += [pl.BlockSpec(w.shape, lambda n: (0, 0)) for w in weights]
    in_specs += [pl.BlockSpec(out_affine.shape, lambda n: (0, 0))]

    out = pl.pallas_call(
        kernel,
        out_shape=jax.ShapeDtypeStruct((N, 1, out_dim), jnp.float32),
        grid=(N,),
        in_specs=in_specs,
        out_specs=pl.BlockSpec((1, 1, out_dim), lambda n: (n, 0, 0)),
        compiler_params=pltpu.CompilerParams(dimension_semantics=("parallel",)),
    )(x2d, *weights, out_affine)

    return out.reshape(N, out_dim)


# ----------------------------------------------------------------------------
# Parameters (torch layouts) + one-time prep of the fused kernel weights
# ----------------------------------------------------------------------------
def init_params(key, input_channels, output_dim, crop_type_start_idx,
                crop_type_embedding_dim=15, reduced_channels=20):
    n_cb = input_channels - 1 - crop_type_start_idx
    n_after = input_channels - n_cb + crop_type_embedding_dim
    ks = jax.random.split(key, 16)

    def w(k, shape):
        fan_in = int(np.prod(shape[1:]))
        return jax.random.normal(k, shape, jnp.float32) / np.sqrt(fan_in)

    def b(k, n):
        return 0.01 * jax.random.normal(k, (n,), jnp.float32)

    return {
        "emb_w": w(ks[0], (crop_type_embedding_dim, n_cb, 1, 1)),
        "emb_b": b(ks[1], crop_type_embedding_dim),
        "dr1_w": w(ks[2], (reduced_channels, n_after, 1, 1)),
        "dr1_b": b(ks[3], reduced_channels),
        "dr2_w": w(ks[4], (reduced_channels, reduced_channels, 1, 1)),
        "dr2_b": b(ks[5], reduced_channels),
        "conv1_w": w(ks[6], (64, reduced_channels, 3, 3)),
        "conv1_b": b(ks[7], 64),
        "conv2_w": w(ks[8], (128, 64, 2, 2)),
        "conv2_b": b(ks[9], 128),
        "fc1_w": w(ks[10], (128, 128)), "fc1_b": b(ks[11], 128),
        "fc2_w": w(ks[12], (64, 128)), "fc2_b": b(ks[13], 64),
        "fc3_w": w(ks[14], (output_dim, 64)), "fc3_b": b(ks[15], output_dim),
    }


def prepare_fused_params(params, input_channels, crop_type_start_idx,
                         crop_type_embedding_dim=15, reduced_channels=20):
    """One-time weight prep: fold embedding+concat+dim_red_1 into one 1x1 conv
    (exact), and re-layout conv/fc weights for x @ W GEMMs in the kernel."""
    non_crop = list(range(crop_type_start_idx)) + [input_channels - 1]
    crop = list(range(crop_type_start_idx, input_channels - 1))
    n_nc = len(non_crop)

    we = params["emb_w"].reshape(crop_type_embedding_dim, len(crop))
    be = params["emb_b"]
    wd1 = params["dr1_w"].reshape(reduced_channels, n_nc + crop_type_embedding_dim)
    bd1 = params["dr1_b"]
    wd1_nc, wd1_e = wd1[:, :n_nc], wd1[:, n_nc:]

    w_eff = jnp.zeros((reduced_channels, input_channels), jnp.float32)
    w_eff = w_eff.at[:, jnp.asarray(non_crop)].set(wd1_nc)
    w_eff = w_eff.at[:, jnp.asarray(crop)].set(wd1_e @ we)
    b_eff = wd1_e @ be + bd1

    c1o = params["conv1_w"].shape[0]   # 64
    c2o = params["conv2_w"].shape[0]   # 128
    return {
        "w1": w_eff.T,                                   # (Cin, 20)
        "b1": b_eff.reshape(1, -1),
        "w2": params["dr2_w"].reshape(reduced_channels, reduced_channels).T,
        "b2": params["dr2_b"].reshape(1, -1),
        # rows ordered (dy, dx, cin) to match the kernel's tap accumulation
        "wc1": jnp.transpose(params["conv1_w"], (2, 3, 1, 0)).reshape(9 * reduced_channels, c1o),
        "bc1": params["conv1_b"].reshape(1, -1),
        "g": jnp.asarray(_POOL1_TAP_SELECT),             # (16, 64) pool+im2col selector
        "wc2": jnp.transpose(params["conv2_w"], (2, 3, 1, 0)).reshape(4 * c1o, c2o),
        "bc2": params["conv2_b"].reshape(1, -1),
        "wf1": params["fc1_w"].T, "bf1": params["fc1_b"].reshape(1, -1),
        "wf2": params["fc2_w"].T, "bf2": params["fc2_b"].reshape(1, -1),
        "wf3": params["fc3_w"].T, "bf3": params["fc3_b"].reshape(1, -1),
    }


# ----------------------------------------------------------------------------
# Pure-JAX reference (mirrors the PyTorch module op-for-op) for validation
# ----------------------------------------------------------------------------
def reference_forward(x, params, input_channels, crop_type_start_idx,
                      min_output=None, max_output=None):
    non_crop = list(range(crop_type_start_idx)) + [input_channels - 1]
    crop = list(range(crop_type_start_idx, input_channels - 1))

    def conv(h, w, b, stride=1):
        y = jax.lax.conv_general_dilated(
            h, w, (stride, stride), "VALID",
            dimension_numbers=("NCHW", "OIHW", "NCHW"),
            precision=jax.lax.Precision.HIGHEST)
        return y + b[None, :, None, None]

    def avgpool2(h):
        n, c, hh, ww = h.shape
        return h.reshape(n, c, hh // 2, 2, ww // 2, 2).mean(axis=(3, 5))

    emb = conv(x[:, jnp.asarray(crop), :, :], params["emb_w"], params["emb_b"])
    h = jnp.concatenate([x[:, jnp.asarray(non_crop), :, :], emb], axis=1)
    h = jax.nn.relu(conv(h, params["dr1_w"], params["dr1_b"]))
    h = jax.nn.relu(conv(h, params["dr2_w"], params["dr2_b"]))
    h = avgpool2(jax.nn.relu(conv(h, params["conv1_w"], params["conv1_b"])))
    h = avgpool2(jax.nn.relu(conv(h, params["conv2_w"], params["conv2_b"], stride=2)))
    h = h.reshape(h.shape[0], -1)
    h = jax.nn.relu(h @ params["fc1_w"].T + params["fc1_b"])
    h = jax.nn.relu(h @ params["fc2_w"].T + params["fc2_b"])
    y = h @ params["fc3_w"].T + params["fc3_b"]
    if min_output is not None and max_output is not None:
        scale = (max_output - min_output) / 2.0
        mean = (max_output + min_output) / 2.0
        y = jnp.tanh(y) * scale + mean
    return y


if __name__ == "__main__":
    batch = 2
    input_channels = 9            # crop bands [4..7] embed -> 15; 5 + 15 = 20 after embedding
    crop_type_start_idx = 4
    output_dim = 8
    H = W = 10                    # required so the flattened features are 128*1*1
    min_output, max_output = -2.0, 4.0

    key = jax.random.PRNGKey(0)
    kx, kp = jax.random.split(key)
    x = jax.random.normal(kx, (batch, input_channels, H, W), jnp.float32)
    params = init_params(kp, input_channels, output_dim, crop_type_start_idx)

    fused = prepare_fused_params(params, input_channels, crop_type_start_idx)
    out_affine = jnp.asarray([[(max_output - min_output) / 2.0,
                               (max_output + min_output) / 2.0]], jnp.float32)

    fwd = jax.jit(functools.partial(simple_cnn_small_forward, restrict_output=True))
    out = jax.block_until_ready(fwd(x, fused, out_affine))

    assert out.shape == (batch, output_dim), out.shape
    assert out.dtype == jnp.float32
    assert bool(jnp.all(jnp.isfinite(out)))

    ref = reference_forward(x, params, input_channels, crop_type_start_idx,
                            min_output=min_output, max_output=max_output)
    assert bool(jnp.allclose(out, ref, rtol=1e-2, atol=1e-2)), (out, ref)

    print("KERNEL_OK")
</pallas_src>

<mosaic_0001>
module attributes {stable_mosaic.version = 11 : i64} {
  func.func @_fused_cnn_kernel(%arg0: i32, %arg1: memref<1x100x9xf32, #tpu.memory_space<vmem>>, %arg2: memref<9x20xf32, #tpu.memory_space<vmem>>, %arg3: memref<1x20xf32, #tpu.memory_space<vmem>>, %arg4: memref<20x20xf32, #tpu.memory_space<vmem>>, %arg5: memref<1x20xf32, #tpu.memory_space<vmem>>, %arg6: memref<180x64xf32, #tpu.memory_space<vmem>>, %arg7: memref<1x64xf32, #tpu.memory_space<vmem>>, %arg8: memref<16x64xf32, #tpu.memory_space<vmem>>, %arg9: memref<256x128xf32, #tpu.memory_space<vmem>>, %arg10: memref<1x128xf32, #tpu.memory_space<vmem>>, %arg11: memref<128x128xf32, #tpu.memory_space<vmem>>, %arg12: memref<1x128xf32, #tpu.memory_space<vmem>>, %arg13: memref<128x64xf32, #tpu.memory_space<vmem>>, %arg14: memref<1x64xf32, #tpu.memory_space<vmem>>, %arg15: memref<64x8xf32, #tpu.memory_space<vmem>>, %arg16: memref<1x8xf32, #tpu.memory_space<vmem>>, %arg17: memref<1x2xf32, #tpu.memory_space<vmem>>, %arg18: memref<1x1x8xf32, #tpu.memory_space<vmem>>) attributes {dimension_semantics = [#tpu.dimension_semantics<parallel>], iteration_bounds = array<i64: 2>, scalar_prefetch = 0 : i64, scratch_operands = 0 : i64, tpu.core_type = #tpu.core_type<tc>, window_params = [{transform_indices = @transform_0, window_bounds = array<i64: 1, 100, 9>}, {pipeline_mode = #tpu.pipeline_mode<synchronous>, transform_indices = @transform_1, window_bounds = array<i64: 9, 20>}, {pipeline_mode = #tpu.pipeline_mode<synchronous>, transform_indices = @transform_2, window_bounds = array<i64: 1, 20>}, {pipeline_mode = #tpu.pipeline_mode<synchronous>, transform_indices = @transform_3, window_bounds = array<i64: 20, 20>}, {pipeline_mode = #tpu.pipeline_mode<synchronous>, transform_indices = @transform_4, window_bounds = array<i64: 1, 20>}, {pipeline_mode = #tpu.pipeline_mode<synchronous>, transform_indices = @transform_5, window_bounds = array<i64: 180, 64>}, {pipeline_mode = #tpu.pipeline_mode<synchronous>, transform_indices = @transform_6, window_bounds = array<i64: 1, 64>}, {pipeline_mode = #tpu.pipeline_mode<synchronous>, transform_indices = @transform_7, window_bounds = array<i64: 16, 64>}, {pipeline_mode = #tpu.pipeline_mode<synchronous>, transform_indices = @transform_8, window_bounds = array<i64: 256, 128>}, {pipeline_mode = #tpu.pipeline_mode<synchronous>, transform_indices = @transform_9, window_bounds = array<i64: 1, 128>}, {pipeline_mode = #tpu.pipeline_mode<synchronous>, transform_indices = @transform_10, window_bounds = array<i64: 128, 128>}, {pipeline_mode = #tpu.pipeline_mode<synchronous>, transform_indices = @transform_11, window_bounds = array<i64: 1, 128>}, {pipeline_mode = #tpu.pipeline_mode<synchronous>, transform_indices = @transform_12, window_bounds = array<i64: 128, 64>}, {pipeline_mode = #tpu.pipeline_mode<synchronous>, transform_indices = @transform_13, window_bounds = array<i64: 1, 64>}, {pipeline_mode = #tpu.pipeline_mode<synchronous>, transform_indices = @transform_14, window_bounds = array<i64: 64, 8>}, {pipeline_mode = #tpu.pipeline_mode<synchronous>, transform_indices = @transform_15, window_bounds = array<i64: 1, 8>}, {pipeline_mode = #tpu.pipeline_mode<synchronous>, transform_indices = @transform_16, window_bounds = array<i64: 1, 2>}, {transform_indices = @transform_17, window_bounds = array<i64: 1, 1, 8>}]} {
    %c0 = arith.constant 0 : index
    %c0_0 = arith.constant 0 : index
    %c0_1 = arith.constant 0 : index
    %0 = vector.load %arg1[%c0, %c0_0, %c0_1] : memref<1x100x9xf32, #tpu.memory_space<vmem>>, vector<1x100x9xf32>
    %1 = vector.shape_cast %0 : vector<1x100x9xf32> to vector<100x9xf32>
    %c0_2 = arith.constant 0 : index
    %c0_3 = arith.constant 0 : index
    %2 = vector.load %arg2[%c0_2, %c0_3] : memref<9x20xf32, #tpu.memory_space<vmem>>, vector<9x20xf32>
    %cst = arith.constant dense<0.000000e+00> : vector<100x20xf32>
    %3 = tpu.matmul %1, %2, %cst {dimension_numbers = #tpu.dot_dimension_numbers<[1], [0], [0], [1], [0, 0, 1, 1], [], []>} : vector<100x9xf32>, vector<9x20xf32>, vector<100x20xf32> -> vector<100x20xf32>
    %c0_4 = arith.constant 0 : index
    %c0_5 = arith.constant 0 : index
    %4 = vector.load %arg3[%c0_4, %c0_5] : memref<1x20xf32, #tpu.memory_space<vmem>>, vector<1x20xf32>
    %5 = vector.broadcast %4 : vector<1x20xf32> to vector<100x20xf32>
    %6 = arith.addf %3, %5 : vector<100x20xf32>
    %cst_6 = arith.constant 0.000000e+00 : f32
    %7 = vector.broadcast %cst_6 : f32 to vector<100x20xf32>
    %8 = arith.maximumf %6, %7 : vector<100x20xf32>
    %c0_7 = arith.constant 0 : index
    %c0_8 = arith.constant 0 : index
    %9 = vector.load %arg4[%c0_7, %c0_8] : memref<20x20xf32, #tpu.memory_space<vmem>>, vector<20x20xf32>
    %cst_9 = arith.constant dense<0.000000e+00> : vector<100x20xf32>
    %10 = tpu.matmul %8, %9, %cst_9 {dimension_numbers = #tpu.dot_dimension_numbers<[1], [0], [0], [1], [0, 0, 1, 1], [], []>} : vector<100x20xf32>, vector<20x20xf32>, vector<100x20xf32> -> vector<100x20xf32>
    %c0_10 = arith.constant 0 : index
    %c0_11 = arith.constant 0 : index
    %11 = vector.load %arg5[%c0_10, %c0_11] : memref<1x20xf32, #tpu.memory_space<vmem>>, vector<1x20xf32>
    %12 = vector.broadcast %11 : vector<1x20xf32> to vector<100x20xf32>
    %13 = arith.addf %10, %12 : vector<100x20xf32>
    %cst_12 = arith.constant 0.000000e+00 : f32
    %14 = vector.broadcast %cst_12 : f32 to vector<100x20xf32>
    %15 = arith.maximumf %13, %14 : vector<100x20xf32>
    %16 = vector.extract_strided_slice %15 {offsets = [0, 0], sizes = [8, 20], strides = [1, 1]} : vector<100x20xf32> to vector<8x20xf32>
    %17 = vector.extract_strided_slice %15 {offsets = [10, 0], sizes = [8, 20], strides = [1, 1]} : vector<100x20xf32> to vector<8x20xf32>
    %18 = vector.extract_strided_slice %15 {offsets = [20, 0], sizes = [8, 20], strides = [1, 1]} : vector<100x20xf32> to vector<8x20xf32>
    %19 = vector.extract_strided_slice %15 {offsets = [30, 0], sizes = [8, 20], strides = [1, 1]} : vector<100x20xf32> to vector<8x20xf32>
    %20 = vector.extract_strided_slice %15 {offsets = [40, 0], sizes = [8, 20], strides = [1, 1]} : vector<100x20xf32> to vector<8x20xf32>
    %21 = vector.extract_strided_slice %15 {offsets = [50, 0], sizes = [8, 20], strides = [1, 1]} : vector<100x20xf32> to vector<8x20xf32>
    %22 = vector.extract_strided_slice %15 {offsets = [60, 0], sizes = [8, 20], strides = [1, 1]} : vector<100x20xf32> to vector<8x20xf32>
    %23 = vector.extract_strided_slice %15 {offsets = [70, 0], sizes = [8, 20], strides = [1, 1]} : vector<100x20xf32> to vector<8x20xf32>
    %24 = vector.extract_strided_slice %15 {offsets = [80, 0], sizes = [8, 20], strides = [1, 1]} : vector<100x20xf32> to vector<8x20xf32>
    %25 = vector.extract_strided_slice %15 {offsets = [90, 0], sizes = [8, 20], strides = [1, 1]} : vector<100x20xf32> to vector<8x20xf32>
    %26 = tpu.concatenate %16, %17, %18, %19, %20, %21, %22, %23, %24, %25 in 0 : vector<8x20xf32>, vector<8x20xf32>, vector<8x20xf32>, vector<8x20xf32>, vector<8x20xf32>, vector<8x20xf32>, vector<8x20xf32>, vector<8x20xf32>, vector<8x20xf32>, vector<8x20xf32> -> vector<80x20xf32>
    %27 = vector.extract_strided_slice %15 {offsets = [1, 0], sizes = [8, 20], strides = [1, 1]} : vector<100x20xf32> to vector<8x20xf32>
    %28 = vector.extract_strided_slice %15 {offsets = [11, 0], sizes = [8, 20], strides = [1, 1]} : vector<100x20xf32> to vector<8x20xf32>
    %29 = vector.extract_strided_slice %15 {offsets = [21, 0], sizes = [8, 20], strides = [1, 1]} : vector<100x20xf32> to vector<8x20xf32>
    %30 = vector.extract_strided_slice %15 {offsets = [31, 0], sizes = [8, 20], strides = [1, 1]} : vector<100x20xf32> to vector<8x20xf32>
    %31 = vector.extract_strided_slice %15 {offsets = [41, 0], sizes = [8, 20], strides = [1, 1]} : vector<100x20xf32> to vector<8x20xf32>
    %32 = vector.extract_strided_slice %15 {offsets = [51, 0], sizes = [8, 20], strides = [1, 1]} : vector<100x20xf32> to vector<8x20xf32>
    %33 = vector.extract_strided_slice %15 {offsets = [61, 0], sizes = [8, 20], strides = [1, 1]} : vector<100x20xf32> to vector<8x20xf32>
    %34 = vector.extract_strided_slice %15 {offsets = [71, 0], sizes = [8, 20], strides = [1, 1]} : vector<100x20xf32> to vector<8x20xf32>
    %35 = vector.extract_strided_slice %15 {offsets = [81, 0], sizes = [8, 20], strides = [1, 1]} : vector<100x20xf32> to vector<8x20xf32>
    %36 = vector.extract_strided_slice %15 {offsets = [91, 0], sizes = [8, 20], strides = [1, 1]} : vector<100x20xf32> to vector<8x20xf32>
    %37 = tpu.concatenate %27, %28, %29, %30, %31, %32, %33, %34, %35, %36 in 0 : vector<8x20xf32>, vector<8x20xf32>, vector<8x20xf32>, vector<8x20xf32>, vector<8x20xf32>, vector<8x20xf32>, vector<8x20xf32>, vector<8x20xf32>, vector<8x20xf32>, vector<8x20xf32> -> vector<80x20xf32>
    %38 = vector.extract_strided_slice %15 {offsets = [2, 0], sizes = [8, 20], strides = [1, 1]} : vector<100x20xf32> to vector<8x20xf32>
    %39 = vector.extract_strided_slice %15 {offsets = [12, 0], sizes = [8, 20], strides = [1, 1]} : vector<100x20xf32> to vector<8x20xf32>
    %40 = vector.extract_strided_slice %15 {offsets = [22, 0], sizes = [8, 20], strides = [1, 1]} : vector<100x20xf32> to vector<8x20xf32>
    %41 = vector.extract_strided_slice %15 {offsets = [32, 0], sizes = [8, 20], strides = [1, 1]} : vector<100x20xf32> to vector<8x20xf32>
    %42 = vector.extract_strided_slice %15 {offsets = [42, 0], sizes = [8, 20], strides = [1, 1]} : vector<100x20xf32> to vector<8x20xf32>
    %43 = vector.extract_strided_slice %15 {offsets = [52, 0], sizes = [8, 20], strides = [1, 1]} : vector<100x20xf32> to vector<8x20xf32>
    %44 = vector.extract_strided_slice %15 {offsets = [62, 0], sizes = [8, 20], strides = [1, 1]} : vector<100x20xf32> to vector<8x20xf32>
    %45 = vector.extract_strided_slice %15 {offsets = [72, 0], sizes = [8, 20], strides = [1, 1]} : vector<100x20xf32> to vector<8x20xf32>
    %46 = vector.extract_strided_slice %15 {offsets = [82, 0], sizes = [8, 20], strides = [1, 1]} : vector<100x20xf32> to vector<8x20xf32>
    %47 = vector.extract_strided_slice %15 {offsets = [92, 0], sizes = [8, 20], strides = [1, 1]} : vector<100x20xf32> to vector<8x20xf32>
    %48 = tpu.concatenate %38, %39, %40, %41, %42, %43, %44, %45, %46, %47 in 0 : vector<8x20xf32>, vector<8x20xf32>, vector<8x20xf32>, vector<8x20xf32>, vector<8x20xf32>, vector<8x20xf32>, vector<8x20xf32>, vector<8x20xf32>, vector<8x20xf32>, vector<8x20xf32> -> vector<80x20xf32>
    %cst_13 = arith.constant 0.000000e+00 : f32
    %49 = vector.broadcast %cst_13 : f32 to vector<64x64xf32>
    %50 = vector.extract_strided_slice %26 {offsets = [0, 0], sizes = [64, 20], strides = [1, 1]} : vector<80x20xf32> to vector<64x20xf32>
    %c0_14 = arith.constant 0 : index
    %c0_15 = arith.constant 0 : index
    %51 = vector.load %arg6[%c0_14, %c0_15] : memref<180x64xf32, #tpu.memory_space<vmem>>, vector<20x64xf32>
    %cst_16 = arith.constant dense<0.000000e+00> : vector<64x64xf32>
    %52 = tpu.matmul %50, %51, %cst_16 {dimension_numbers = #tpu.dot_dimension_numbers<[1], [0], [0], [1], [0, 0, 1, 1], [], []>} : vector<64x20xf32>, vector<20x64xf32>, vector<64x64xf32> -> vector<64x64xf32>
    %53 = arith.addf %49, %52 : vector<64x64xf32>
    %54 = vector.extract_strided_slice %37 {offsets = [0, 0], sizes = [64, 20], strides = [1, 1]} : vector<80x20xf32> to vector<64x20xf32>
    %c20 = arith.constant 20 : index
    %c0_17 = arith.constant 0 : index
    %55 = vector.load %arg6[%c20, %c0_17] : memref<180x64xf32, #tpu.memory_space<vmem>>, vector<20x64xf32>
    %cst_18 = arith.constant dense<0.000000e+00> : vector<64x64xf32>
    %56 = tpu.matmul %54, %55, %cst_18 {dimension_numbers = #tpu.dot_dimension_numbers<[1], [0], [0], [1], [0, 0, 1, 1], [], []>} : vector<64x20xf32>, vector<20x64xf32>, vector<64x64xf32> -> vector<64x64xf32>
    %57 = arith.addf %53, %56 : vector<64x64xf32>
    %58 = vector.extract_strided_slice %48 {offsets = [0, 0], sizes = [64, 20], strides = [1, 1]} : vector<80x20xf32> to vector<64x20xf32>
    %c40 = arith.constant 40 : index
    %c0_19 = arith.constant 0 : index
    %59 = vector.load %arg6[%c40, %c0_19] : memref<180x64xf32, #tpu.memory_space<vmem>>, vector<20x64xf32>
    %cst_20 = arith.constant dense<0.000000e+00> : vector<64x64xf32>
    %60 = tpu.matmul %58, %59, %cst_20 {dimension_numbers = #tpu.dot_dimension_numbers<[1], [0], [0], [1], [0, 0, 1, 1], [], []>} : vector<64x20xf32>, vector<20x64xf32>, vector<64x64xf32> -> vector<64x64xf32>
    %61 = arith.addf %57, %60 : vector<64x64xf32>
    %62 = vector.extract_strided_slice %26 {offsets = [8, 0], sizes = [64, 20], strides = [1, 1]} : vector<80x20xf32> to vector<64x20xf32>
    %c60 = arith.constant 60 : index
    %c0_21 = arith.constant 0 : index
    %63 = vector.load %arg6[%c60, %c0_21] : memref<180x64xf32, #tpu.memory_space<vmem>>, vector<20x64xf32>
    %cst_22 = arith.constant dense<0.000000e+00> : vector<64x64xf32>
    %64 = tpu.matmul %62, %63, %cst_22 {dimension_numbers = #tpu.dot_dimension_numbers<[1], [0], [0], [1], [0, 0, 1, 1], [], []>} : vector<64x20xf32>, vector<20x64xf32>, vector<64x64xf32> -> vector<64x64xf32>
    %65 = arith.addf %61, %64 : vector<64x64xf32>
    %66 = vector.extract_strided_slice %37 {offsets = [8, 0], sizes = [64, 20], strides = [1, 1]} : vector<80x20xf32> to vector<64x20xf32>
    %c80 = arith.constant 80 : index
    %c0_23 = arith.constant 0 : index
    %67 = vector.load %arg6[%c80, %c0_23] : memref<180x64xf32, #tpu.memory_space<vmem>>, vector<20x64xf32>
    %cst_24 = arith.constant dense<0.000000e+00> : vector<64x64xf32>
    %68 = tpu.matmul %66, %67, %cst_24 {dimension_numbers = #tpu.dot_dimension_numbers<[1], [0], [0], [1], [0, 0, 1, 1], [], []>} : vector<64x20xf32>, vector<20x64xf32>, vector<64x64xf32> -> vector<64x64xf32>
    %69 = arith.addf %65, %68 : vector<64x64xf32>
    %70 = vector.extract_strided_slice %48 {offsets = [8, 0], sizes = [64, 20], strides = [1, 1]} : vector<80x20xf32> to vector<64x20xf32>
    %c100 = arith.constant 100 : index
    %c0_25 = arith.constant 0 : index
    %71 = vector.load %arg6[%c100, %c0_25] : memref<180x64xf32, #tpu.memory_space<vmem>>, vector<20x64xf32>
    %cst_26 = arith.constant dense<0.000000e+00> : vector<64x64xf32>
    %72 = tpu.matmul %70, %71, %cst_26 {dimension_numbers = #tpu.dot_dimension_numbers<[1], [0], [0], [1], [0, 0, 1, 1], [], []>} : vector<64x20xf32>, vector<20x64xf32>, vector<64x64xf32> -> vector<64x64xf32>
    %73 = arith.addf %69, %72 : vector<64x64xf32>
    %74 = vector.extract_strided_slice %26 {offsets = [16, 0], sizes = [64, 20], strides = [1, 1]} : vector<80x20xf32> to vector<64x20xf32>
    %c120 = arith.constant 120 : index
    %c0_27 = arith.constant 0 : index
    %75 = vector.load %arg6[%c120, %c0_27] : memref<180x64xf32, #tpu.memory_space<vmem>>, vector<20x64xf32>
    %cst_28 = arith.constant dense<0.000000e+00> : vector<64x64xf32>
    %76 = tpu.matmul %74, %75, %cst_28 {dimension_numbers = #tpu.dot_dimension_numbers<[1], [0], [0], [1], [0, 0, 1, 1], [], []>} : vector<64x20xf32>, vector<20x64xf32>, vector<64x64xf32> -> vector<64x64xf32>
    %77 = arith.addf %73, %76 : vector<64x64xf32>
    %78 = vector.extract_strided_slice %37 {offsets = [16, 0], sizes = [64, 20], strides = [1, 1]} : vector<80x20xf32> to vector<64x20xf32>
    %c140 = arith.constant 140 : index
    %c0_29 = arith.constant 0 : index
    %79 = vector.load %arg6[%c140, %c0_29] : memref<180x64xf32, #tpu.memory_space<vmem>>, vector<20x64xf32>
    %cst_30 = arith.constant dense<0.000000e+00> : vector<64x64xf32>
    %80 = tpu.matmul %78, %79, %cst_30 {dimension_numbers = #tpu.dot_dimension_numbers<[1], [0], [0], [1], [0, 0, 1, 1], [], []>} : vector<64x20xf32>, vector<20x64xf32>, vector<64x64xf32> -> vector<64x64xf32>
    %81 = arith.addf %77, %80 : vector<64x64xf32>
    %82 = vector.extract_strided_slice %48 {offsets = [16, 0], sizes = [64, 20], strides = [1, 1]} : vector<80x20xf32> to vector<64x20xf32>
    %c160 = arith.constant 160 : index
    %c0_31 = arith.constant 0 : index
    %83 = vector.load %arg6[%c160, %c0_31] : memref<180x64xf32, #tpu.memory_space<vmem>>, vector<20x64xf32>
    %cst_32 = arith.constant dense<0.000000e+00> : vector<64x64xf32>
    %84 = tpu.matmul %82, %83, %cst_32 {dimension_numbers = #tpu.dot_dimension_numbers<[1], [0], [0], [1], [0, 0, 1, 1], [], []>} : vector<64x20xf32>, vector<20x64xf32>, vector<64x64xf32> -> vector<64x64xf32>
    %85 = arith.addf %81, %84 : vector<64x64xf32>
    %c0_33 = arith.constant 0 : index
    %c0_34 = arith.constant 0 : index
    %86 = vector.load %arg7[%c0_33, %c0_34] : memref<1x64xf32, #tpu.memory_space<vmem>>, vector<1x64xf32>
    %87 = vector.broadcast %86 : vector<1x64xf32> to vector<64x64xf32>
    %88 = arith.addf %85, %87 : vector<64x64xf32>
    %cst_35 = arith.constant 0.000000e+00 : f32
    %89 = vector.broadcast %cst_35 : f32 to vector<64x64xf32>
    %90 = arith.maximumf %88, %89 : vector<64x64xf32>
    %c0_36 = arith.constant 0 : index
    %c0_37 = arith.constant 0 : index
    %91 = vector.load %arg8[%c0_36, %c0_37] : memref<16x64xf32, #tpu.memory_space<vmem>>, vector<16x64xf32>
    %cst_38 = arith.constant dense<0.000000e+00> : vector<16x64xf32>
    %92 = tpu.matmul %91, %90, %cst_38 {dimension_numbers = #tpu.dot_dimension_numbers<[1], [0], [0], [1], [0, 0, 1, 1], [], []>} : vector<16x64xf32>, vector<64x64xf32>, vector<16x64xf32> -> vector<16x64xf32>
    %cst_39 = arith.constant 0.000000e+00 : f32
    %93 = vector.broadcast %cst_39 : f32 to vector<4x128xf32>
    %94 = vector.extract_strided_slice %92 {offsets = [0, 0], sizes = [4, 64], strides = [1, 1]} : vector<16x64xf32> to vector<4x64xf32>
    %c0_40 = arith.constant 0 : index
    %c0_41 = arith.constant 0 : index
    %95 = vector.load %arg9[%c0_40, %c0_41] : memref<256x128xf32, #tpu.memory_space<vmem>>, vector<64x128xf32>
    %cst_42 = arith.constant dense<0.000000e+00> : vector<4x128xf32>
    %96 = tpu.matmul %94, %95, %cst_42 {dimension_numbers = #tpu.dot_dimension_numbers<[1], [0], [0], [1], [0, 0, 1, 1], [], []>} : vector<4x64xf32>, vector<64x128xf32>, vector<4x128xf32> -> vector<4x128xf32>
    %97 = arith.addf %93, %96 : vector<4x128xf32>
    %98 = vector.extract_strided_slice %92 {offsets = [4, 0], sizes = [4, 64], strides = [1, 1]} : vector<16x64xf32> to vector<4x64xf32>
    %c64 = arith.constant 64 : index
    %c0_43 = arith.constant 0 : index
    %99 = vector.load %arg9[%c64, %c0_43] : memref<256x128xf32, #tpu.memory_space<vmem>>, vector<64x128xf32>
    %cst_44 = arith.constant dense<0.000000e+00> : vector<4x128xf32>
    %100 = tpu.matmul %98, %99, %cst_44 {dimension_numbers = #tpu.dot_dimension_numbers<[1], [0], [0], [1], [0, 0, 1, 1], [], []>} : vector<4x64xf32>, vector<64x128xf32>, vector<4x128xf32> -> vector<4x128xf32>
    %101 = arith.addf %97, %100 : vector<4x128xf32>
    %102 = vector.extract_strided_slice %92 {offsets = [8, 0], sizes = [4, 64], strides = [1, 1]} : vector<16x64xf32> to vector<4x64xf32>
    %c128 = arith.constant 128 : index
    %c0_45 = arith.constant 0 : index
    %103 = vector.load %arg9[%c128, %c0_45] : memref<256x128xf32, #tpu.memory_space<vmem>>, vector<64x128xf32>
    %cst_46 = arith.constant dense<0.000000e+00> : vector<4x128xf32>
    %104 = tpu.matmul %102, %103, %cst_46 {dimension_numbers = #tpu.dot_dimension_numbers<[1], [0], [0], [1], [0, 0, 1, 1], [], []>} : vector<4x64xf32>, vector<64x128xf32>, vector<4x128xf32> -> vector<4x128xf32>
    %105 = arith.addf %101, %104 : vector<4x128xf32>
    %106 = vector.extract_strided_slice %92 {offsets = [12, 0], sizes = [4, 64], strides = [1, 1]} : vector<16x64xf32> to vector<4x64xf32>
    %c192 = arith.constant 192 : index
    %c0_47 = arith.constant 0 : index
    %107 = vector.load %arg9[%c192, %c0_47] : memref<256x128xf32, #tpu.memory_space<vmem>>, vector<64x128xf32>
    %cst_48 = arith.constant dense<0.000000e+00> : vector<4x128xf32>
    %108 = tpu.matmul %106, %107, %cst_48 {dimension_numbers = #tpu.dot_dimension_numbers<[1], [0], [0], [1], [0, 0, 1, 1], [], []>} : vector<4x64xf32>, vector<64x128xf32>, vector<4x128xf32> -> vector<4x128xf32>
    %109 = arith.addf %105, %108 : vector<4x128xf32>
    %c0_49 = arith.constant 0 : index
    %c0_50 = arith.constant 0 : index
    %110 = vector.load %arg10[%c0_49, %c0_50] : memref<1x128xf32, #tpu.memory_space<vmem>>, vector<1x128xf32>
    %111 = vector.broadcast %110 : vector<1x128xf32> to vector<4x128xf32>
    %112 = arith.addf %109, %111 : vector<4x128xf32>
    %cst_51 = arith.constant 0.000000e+00 : f32
    %113 = vector.broadcast %cst_51 : f32 to vector<4x128xf32>
    %114 = arith.maximumf %112, %113 : vector<4x128xf32>
    %cst_52 = arith.constant dense<0.000000e+00> : vector<128xf32>
    %115 = vector.multi_reduction <add>, %114, %cst_52 [0] : vector<4x128xf32> to vector<128xf32>
    %116 = vector.shape_cast %115 : vector<128xf32> to vector<1x128xf32>
    %cst_53 = arith.constant 2.500000e-01 : f32
    %117 = vector.broadcast %cst_53 : f32 to vector<1x128xf32>
    %118 = arith.mulf %116, %117 : vector<1x128xf32>
    %c0_54 = arith.constant 0 : index
    %c0_55 = arith.constant 0 : index
    %119 = vector.load %arg11[%c0_54, %c0_55] : memref<128x128xf32, #tpu.memory_space<vmem>>, vector<128x128xf32>
    %cst_56 = arith.constant dense<0.000000e+00> : vector<1x128xf32>
    %120 = tpu.matmul %118, %119, %cst_56 {dimension_numbers = #tpu.dot_dimension_numbers<[1], [0], [0], [1], [0, 0, 1, 1], [], []>} : vector<1x128xf32>, vector<128x128xf32>, vector<1x128xf32> -> vector<1x128xf32>
    %c0_57 = arith.constant 0 : index
    %c0_58 = arith.constant 0 : index
    %121 = vector.load %arg12[%c0_57, %c0_58] : memref<1x128xf32, #tpu.memory_space<vmem>>, vector<1x128xf32>
    %122 = arith.addf %120, %121 : vector<1x128xf32>
    %cst_59 = arith.constant 0.000000e+00 : f32
    %123 = vector.broadcast %cst_59 : f32 to vector<1x128xf32>
    %124 = arith.maximumf %122, %123 : vector<1x128xf32>
    %c0_60 = arith.constant 0 : index
    %c0_61 = arith.constant 0 : index
    %125 = vector.load %arg13[%c0_60, %c0_61] : memref<128x64xf32, #tpu.memory_space<vmem>>, vector<128x64xf32>
    %cst_62 = arith.constant dense<0.000000e+00> : vector<1x64xf32>
    %126 = tpu.matmul %124, %125, %cst_62 {dimension_numbers = #tpu.dot_dimension_numbers<[1], [0], [0], [1], [0, 0, 1, 1], [], []>} : vector<1x128xf32>, vector<128x64xf32>, vector<1x64xf32> -> vector<1x64xf32>
    %c0_63 = arith.constant 0 : index
    %c0_64 = arith.constant 0 : index
    %127 = vector.load %arg14[%c0_63, %c0_64] : memref<1x64xf32, #tpu.memory_space<vmem>>, vector<1x64xf32>
    %128 = arith.addf %126, %127 : vector<1x64xf32>
    %cst_65 = arith.constant 0.000000e+00 : f32
    %129 = vector.broadcast %cst_65 : f32 to vector<1x64xf32>
    %130 = arith.maximumf %128, %129 : vector<1x64xf32>
    %c0_66 = arith.constant 0 : index
    %c0_67 = arith.constant 0 : index
    %131 = vector.load %arg15[%c0_66, %c0_67] : memref<64x8xf32, #tpu.memory_space<vmem>>, vector<64x8xf32>
    %cst_68 = arith.constant dense<0.000000e+00> : vector<1x8xf32>
    %132 = tpu.matmul %130, %131, %cst_68 {dimension_numbers = #tpu.dot_dimension_numbers<[1], [0], [0], [1], [0, 0, 1, 1], [], []>} : vector<1x64xf32>, vector<64x8xf32>, vector<1x8xf32> -> vector<1x8xf32>
    %c0_69 = arith.constant 0 : index
    %c0_70 = arith.constant 0 : index
    %133 = vector.load %arg16[%c0_69, %c0_70] : memref<1x8xf32, #tpu.memory_space<vmem>>, vector<1x8xf32>
    %134 = arith.addf %132, %133 : vector<1x8xf32>
    %c0_71 = arith.constant 0 : index
    %c0_72 = arith.constant 0 : index
    %135 = vector.load %arg17[%c0_71, %c0_72] : memref<1x2xf32, #tpu.memory_space<vmem>>, vector<1x1xf32>
    %c0_73 = arith.constant 0 : index
    %c1 = arith.constant 1 : index
    %136 = vector.load %arg17[%c0_73, %c1] : memref<1x2xf32, #tpu.memory_space<vmem>>, vector<1x1xf32>
    %137 = math.tanh %134 : vector<1x8xf32>
    %138 = vector.broadcast %135 : vector<1x1xf32> to vector<1x8xf32>
    %139 = arith.mulf %137, %138 : vector<1x8xf32>
    %140 = vector.broadcast %136 : vector<1x1xf32> to vector<1x8xf32>
    %141 = arith.addf %139, %140 : vector<1x8xf32>
    %c0_74 = arith.constant 0 : index
    %c0_75 = arith.constant 0 : index
    %c0_76 = arith.constant 0 : index
    %142 = vector.load %arg18[%c0_74, %c0_75, %c0_76] : memref<1x1x8xf32, #tpu.memory_space<vmem>>, vector<1x1x8xf32>
    %143 = vector.shape_cast %142 : vector<1x1x8xf32> to vector<1x8xf32>
    %144 = vector.shape_cast %141 : vector<1x8xf32> to vector<1x1x8xf32>
    tpu.vector_store %arg18[%c0_74, %c0_75, %c0_76], %144 {strides = array<i32>} : memref<1x1x8xf32, #tpu.memory_space<vmem>>, vector<1x1x8xf32>,
    return
  }
  func.func @transform_0(%arg0: i32) -> (i32, i32, i32) {
    %c0_i32 = arith.constant 0 : i32
    %c0_i32_0 = arith.constant 0 : i32
    %c0_i32_1 = arith.constant 0 : i32
    return %arg0, %c0_i32, %c0_i32_0 : i32, i32, i32
  }
  func.func @transform_1(%arg0: i32) -> (i32, i32) {
    %c0_i32 = arith.constant 0 : i32
    %c0_i32_0 = arith.constant 0 : i32
    %c0_i32_1 = arith.constant 0 : i32
    return %c0_i32, %c0_i32_0 : i32, i32
  }
  func.func @transform_2(%arg0: i32) -> (i32, i32) {
    %c0_i32 = arith.constant 0 : i32
    %c0_i32_0 = arith.constant 0 : i32
    %c0_i32_1 = arith.constant 0 : i32
    return %c0_i32, %c0_i32_0 : i32, i32
  }
  func.func @transform_3(%arg0: i32) -> (i32, i32) {
    %c0_i32 = arith.constant 0 : i32
    %c0_i32_0 = arith.constant 0 : i32
    %c0_i32_1 = arith.constant 0 : i32
    return %c0_i32, %c0_i32_0 : i32, i32
  }
  func.func @transform_4(%arg0: i32) -> (i32, i32) {
    %c0_i32 = arith.constant 0 : i32
    %c0_i32_0 = arith.constant 0 : i32
    %c0_i32_1 = arith.constant 0 : i32
    return %c0_i32, %c0_i32_0 : i32, i32
  }
  func.func @transform_5(%arg0: i32) -> (i32, i32) {
    %c0_i32 = arith.constant 0 : i32
    %c0_i32_0 = arith.constant 0 : i32
    %c0_i32_1 = arith.constant 0 : i32
    return %c0_i32, %c0_i32_0 : i32, i32
  }
  func.func @transform_6(%arg0: i32) -> (i32, i32) {
    %c0_i32 = arith.constant 0 : i32
    %c0_i32_0 = arith.constant 0 : i32
    %c0_i32_1 = arith.constant 0 : i32
    return %c0_i32, %c0_i32_0 : i32, i32
  }
  func.func @transform_7(%arg0: i32) -> (i32, i32) {
    %c0_i32 = arith.constant 0 : i32
    %c0_i32_0 = arith.constant 0 : i32
    %c0_i32_1 = arith.constant 0 : i32
    return %c0_i32, %c0_i32_0 : i32, i32
  }
  func.func @transform_8(%arg0: i32) -> (i32, i32) {
    %c0_i32 = arith.constant 0 : i32
    %c0_i32_0 = arith.constant 0 : i32
    %c0_i32_1 = arith.constant 0 : i32
    return %c0_i32, %c0_i32_0 : i32, i32
  }
  func.func @transform_9(%arg0: i32) -> (i32, i32) {
    %c0_i32 = arith.constant 0 : i32
    %c0_i32_0 = arith.constant 0 : i32
    %c0_i32_1 = arith.constant 0 : i32
    return %c0_i32, %c0_i32_0 : i32, i32
  }
  func.func @transform_10(%arg0: i32) -> (i32, i32) {
    %c0_i32 = arith.constant 0 : i32
    %c0_i32_0 = arith.constant 0 : i32
    %c0_i32_1 = arith.constant 0 : i32
    return %c0_i32, %c0_i32_0 : i32, i32
  }
  func.func @transform_11(%arg0: i32) -> (i32, i32) {
    %c0_i32 = arith.constant 0 : i32
    %c0_i32_0 = arith.constant 0 : i32
    %c0_i32_1 = arith.constant 0 : i32
    return %c0_i32, %c0_i32_0 : i32, i32
  }
  func.func @transform_12(%arg0: i32) -> (i32, i32) {
    %c0_i32 = arith.constant 0 : i32
    %c0_i32_0 = arith.constant 0 : i32
    %c0_i32_1 = arith.constant 0 : i32
    return %c0_i32, %c0_i32_0 : i32, i32
  }
  func.func @transform_13(%arg0: i32) -> (i32, i32) {
    %c0_i32 = arith.constant 0 : i32
    %c0_i32_0 = arith.constant 0 : i32
    %c0_i32_1 = arith.constant 0 : i32
    return %c0_i32, %c0_i32_0 : i32, i32
  }
  func.func @transform_14(%arg0: i32) -> (i32, i32) {
    %c0_i32 = arith.constant 0 : i32
    %c0_i32_0 = arith.constant 0 : i32
    %c0_i32_1 = arith.constant 0 : i32
    return %c0_i32, %c0_i32_0 : i32, i32
  }
  func.func @transform_15(%arg0: i32) -> (i32, i32) {
    %c0_i32 = arith.constant 0 : i32
    %c0_i32_0 = arith.constant 0 : i32
    %c0_i32_1 = arith.constant 0 : i32
    return %c0_i32, %c0_i32_0 : i32, i32
  }
  func.func @transform_16(%arg0: i32) -> (i32, i32) {
    %c0_i32 = arith.constant 0 : i32
    %c0_i32_0 = arith.constant 0 : i32
    %c0_i32_1 = arith.constant 0 : i32
    return %c0_i32, %c0_i32_0 : i32, i32
  }
  func.func @transform_17(%arg0: i32) -> (i32, i32, i32) {
    %c0_i32 = arith.constant 0 : i32
    %c0_i32_0 = arith.constant 0 : i32
    %c0_i32_1 = arith.constant 0 : i32
    return %arg0, %c0_i32, %c0_i32_0 : i32, i32, i32
  }
}

</mosaic_0001>

<bundles_post_ra>
// kernel: simple_cnn_small_forward.1
= control target key start
LH: loop header
LB: loop body
LE: loop exit
PB: predicated region body
PF: predicated region fallthrough
CT: control target
= control target key end

     0   :  { %s4975_s0 = inlined_call_operand.vmem [shape: f32[2,100,9], index: 0, kind: input, shape index: {}]   ;;  %s4976_s1 = inlined_call_operand.vmem [shape: f32[9,20], index: 1, kind: input, shape index: {}]   ;;  %s4977_s2 = inlined_call_operand.vmem [shape: f32[1,20], index: 2, kind: input, shape index: {}]   ;;  %s4978_s3 = inlined_call_operand.vmem [shape: f32[20,20], index: 3, kind: input, shape index: {}]   ;;  %s4979_s4 = inlined_call_operand.vmem [shape: f32[1,20], index: 4, kind: input, shape index: {}]   ;;  %s4980_s5 = inlined_call_operand.vmem [shape: f32[180,64], index: 5, kind: input, shape index: {}]   ;;  %s4981_s6 = inlined_call_operand.vmem [shape: f32[1,64], index: 6, kind: input, shape index: {}]   ;;  %s4982_s7 = inlined_call_operand.vmem [shape: f32[16,64], index: 7, kind: input, shape index: {}]   ;;  %s4983_s8 = inlined_call_operand.vmem [shape: f32[256,128], index: 8, kind: input, shape index: {}]   ;;  %s4984_s9 = inlined_call_operand.vmem [shape: f32[1,128], index: 9, kind: input, shape index: {}]   ;;  %s4985_s10 = inlined_call_operand.vmem [shape: f32[128,128], index: 10, kind: input, shape index: {}]   ;;  %s4986_s11 = inlined_call_operand.vmem [shape: f32[1,128], index: 11, kind: input, shape index: {}]   ;;  %s4987_s12 = inlined_call_operand.vmem [shape: f32[128,64], index: 12, kind: input, shape index: {}]   ;;  %s4988_s13 = inlined_call_operand.vmem [shape: f32[1,64], index: 13, kind: input, shape index: {}]   ;;  %s4989_s14 = inlined_call_operand.vmem [shape: f32[64,8], index: 14, kind: input, shape index: {}]   ;;  %s4990_s15 = inlined_call_operand.vmem [shape: f32[1,8], index: 15, kind: input, shape index: {}]   ;;  %s4991_s16 = inlined_call_operand.vmem [shape: f32[1,2], index: 16, kind: input, shape index: {}]   ;;  %s4992_s17 = inlined_call_operand.hbm [shape: f32[2,1,8], index: 17, kind: output, shape index: {}]  }
   0x1   :  { %4998 = sst [smem:[#allocation16_spill]] %s4975_s0 }
   0x2   :  { %4999 = sst [smem:[#allocation17_spill]] %s4976_s1 }
   0x3   :  { %5000 = sst [smem:[#allocation18_spill]] %s4977_s2 }
   0x4   :  { %5001 = sst [smem:[#allocation19_spill]] %s4978_s3 }
   0x5   :  { %5002 = sst [smem:[#allocation20_spill]] %s4979_s4 }
   0x6   :  { %5003 = sst [smem:[#allocation21_spill]] %s4980_s5 }
   0x7   :  { %22 = vsyncpa [#allocation3], 0 }
   0x8   :  { %24 = vsyncpa [#allocation3 + $0x1], 0  ;;  %s3942_s24 = smov 0   ;;  %s3944_s25 = smov 0  }
   0x9   :  { %s3946_s26 = smov 0   ;;  %s3948_s27 = smov 0  }
   0xa LB: > { %5004 = sst [smem:[#allocation5_spill]] %s3841_s26  ;;  %s3963_s28 = sadd.s32 4294967295, %s3845_s27   ;;  %s3845_s27 = sphi %s3948_s27, %s5037_s27   ;;  %s3841_s26 = sphi %s3946_s26, %s5034_s26   ;;  %s3837_s25 = sphi %s3944_s25, %s5036_s25   ;;  %s3833_s24 = sphi %s3942_s24, %s5035_s24  }
   0xb   : > { %s2952_s29 = sadd.s32 4294967294, %s3845_s27   ;;  %s3967_s0 = sadd.s32 1, %s3845_s27  }
   0xc   : > { %s399_s30 = sadd.s32 1, %s3841_s26  ;;  %s396_s18 = ssub.s32 %s3845_s27, %s3967_s0 }
   0xd   : > { %p409_p0 = scmp.ne.s32.totalorder %s3841_s26, %s3837_s25  ;;  %p397_p1 = scmp.eq.s32.totalorder %s396_s18, 0 }
   0xe   : > { %p410_p2 = scmp.eq.s32.totalorder %s3963_s28, 1  ;;  %p415_p3 = scmp.ne.s32.totalorder %s3837_s25, %s3833_s24 }
   0xf   : > { %p416_p4 = scmp.eq.s32.totalorder %s2952_s29, 1  ;;  %p2955_p7 = scmp.ge.s32.totalorder %s3845_s27, 1 }
  0x10   : > { %s3978_s19 = scalar_select %p397_p1, %s3841_s26, %s399_s30  }
  0x11   : > { %p3980_p5 = por %p410_p2, %p409_p0  ;;  %p3984_p6 = por %p416_p4, %p415_p3 }
  0x12   : > { %5005 = sst [smem:[#allocation6_spill]] %s3978_s19  ;;  %p490_p8 = scmp.lt.s32.totalorder %s3845_s27, 3 }
  0x14   : > { %p491_p9 = pnand %p2955_p7, %p490_p8 }
  0x16   : > { %494 = sbr.rel (%p491_p9) target bundleno = 1798 (0x706), region = 88 }
  0x1b   : > { %s5008_s23 = sld [smem:[#allocation17_spill]]  ;;  %vm608_vm0 = vcmask 1040384   ;;  %v4996_v1 = vmov 0.0   ;;  %vm3848_vm1 = vmmov 0   ;;  %p541_p10 = scmp.lt.s32.totalorder %s3963_s28, 1  ;;  %vm568_vm2 = vcmask 72704  }
  0x1c   : > { %3299 = vmatprep.subr.mxu0 %v4996_v1  ;;  %3303 = vmatprep.mubr.msk.f32.mxu0 %vm3848_vm1, %v4996_v1  ;;  %s5009_s30 = sld [smem:[#allocation16_spill]]  ;;  %vm805_vm3 = vcmask 1043456   ;;  %vm765_vm4 = vcmask 162816   ;;  %vm986_vm5 = vcmask 1046528   ;;  %vm990_vm6 = vcmask 1044480  }
  0x1d   : > { %3733 = vmatprep.subr.mxu1 %v4996_v1  ;;  %s542_s18 = scalar_select %p541_p10, %s3963_s28, 1  ;;  %3336 = vmatprep.mubr.msk.f32.mxu1 %vm3848_vm1, %v4996_v1  ;;  %vm954_vm7 = vcmask 1045504   ;;  %vm994_vm8 = vcmask 1042432   ;;  %vm963_vm9 = vcmask 1041408   ;;  %vm2178_vm10 = vcmask 523264  }
  0x1e   : > { %s5010_s3 = sld [smem:[#allocation19_spill]]  ;;  %vm2882_vm11 = vcmask 57344  }
  0x1f   : > { %s3737_s21 = smul.u32 104, %s542_s18  ;;  %s5011_s5 = sld [smem:[#allocation21_spill]] }
  0x20   : > { %s5012_s2 = sld [smem:[#allocation18_spill]]  ;;  %s539_s18 = sand.u32 1, %s3837_s25  }
  0x21   : > { %v560_v0 = vld [vmem:[%s5008_s23 + $0x8] sm:$0x1]  ;;  %v559_v2 = vld [vmem:[%s5008_s23] sm:$0xff]  ;;  %s5013_s4 = sld [smem:[#allocation20_spill]]  ;;  %s540_s19 = scalar_lea.vmem [#allocation2], %s539_s18 }
  0x22   : > { %3300 = vmatpush3.msk.msra.mxu0 %vm608_vm0, %v560_v0  ;;  %3735 = vmatpush3.msk.msra.mxu1 %vm608_vm0, %v560_v0  ;;  %s4012_s23 = scalar_lea.vmem %s5009_s30, %s3737_s21  ;;  %s2897_s21 = sshll.u32 %s540_s19, 4  ;;  %s2898_s21 = int_to_ptr.vmem [resolvable:$true] %s2897_s21 }
  0x23   : > { %3301 = vmatprep.subr.mxu0 %v4996_v1  ;;  %3734 = vmatprep.subr.mxu1 %v4996_v1  ;;  %v546_v3 = vld [vmem:[%s4012_s23] sm:$0xff]  ;;  %v547_v4 = vld [vmem:[%s4012_s23 + $0x8] sm:$0xff]  ;;  %v557_v5 = vld [vmem:[%s4012_s23 + $0x58] sm:$0xff]  ;;  %s2885_s30 = scalar_lea.sflag [#allocation3], %s539_s18 }
  0x24   : > { %3302 = vmatpush3.msra.mxu0 %v559_v2  ;;  %3736 = vmatpush3.msra.mxu1 %v559_v2  ;;  %v757_v6 = vld [vmem:[%s5010_s3 + $0x10] sm:$0xf]  ;;  %v558_v7 = vld [vmem:[%s4012_s23 + $0x60] sm:$0xf]  ;;  %v549_v9 = vld [vmem:[%s4012_s23 + $0x18] sm:$0xff] }
  0x25   : > { %3342 = vmatprep.subr.mxu1 %v4996_v1  ;;  %3304 = vmatmul.mubr.msk.f32.vlgmr.msra.gmra.mxu0 %vm568_vm2, %v546_v3  ;;  %v548_v8 = vld [vmem:[%s4012_s23 + $0x10] sm:$0xff]  ;;  %v550_v10 = vld [vmem:[%s4012_s23 + $0x20] sm:$0xff]  ;;  %v551_v11 = vld [vmem:[%s4012_s23 + $0x28] sm:$0xff] }
  0x26   : > { %3306 = vmatprep.mubr.msk.f32.mxu0 %vm3848_vm1, %v4996_v1  ;;  %3337 = vmatmul.mubr.msk.f32.vlgmr.msra.gmra.mxu1 %vm568_vm2, %v557_v5  ;;  %v552_v12 = vld [vmem:[%s4012_s23 + $0x30] sm:$0xff]  ;;  %v553_v13 = vld [vmem:[%s4012_s23 + $0x38] sm:$0xff]  ;;  %v554_v14 = vld [vmem:[%s4012_s23 + $0x40] sm:$0xff] }
  0x27   : > { %3339 = vmatprep.mubr.msk.f32.mxu1 %vm3848_vm1, %v4996_v1  ;;  %3343 = vmatpush3.msk.msra.mxu1 %vm805_vm3, %v757_v6  ;;  %v555_v15 = vld [vmem:[%s4012_s23 + $0x48] sm:$0xff]  ;;  %v556_v16 = vld [vmem:[%s4012_s23 + $0x50] sm:$0xff]  ;;  %v755_v18 = vld [vmem:[%s5010_s3] sm:$0xff]  ;;  %s3077_s23 = sshll.u32 %s3963_s28, 4 }
  0x28   : > { %3344 = vmatprep.subr.mxu1 %v4996_v1  ;;  %v756_v17 = vld [vmem:[%s5010_s3 + $0x8] sm:$0xff]  ;;  %v1043_v19 = vld [vmem:[%s5011_s5 + $0x24] sm:$0xf]  ;;  %v1040_v20 = vld [vmem:[%s5011_s5 + $0x10] sm:$0xf]  ;;  %s2895_s29 = scalar_lea.hbm %s4992_s17, %s3077_s23  ;;  %s3851_s3 = smov [#allocation2]  }
  0x29   : > { %3307 = vmatmul.mubr.msk.f32.gmra.mxu0 %vm568_vm2, %v547_v4  ;;  %3345 = vmatpush3.msra.mxu1 %v756_v17  ;;  %v4088_v21 = vld [vmem:[%s5012_s2] ss:$0 sm:$0xff]  ;;  %s3785_s2 = scalar_lea.vmem %s2898_s21, 16 }
  0x2a   : > { %3309 = vmatprep.mubr.msk.f32.mxu0 %vm3848_vm1, %v4996_v1  ;;  %3340 = vmatmul.mubr.msk.f32.gmra.mxu1 %vm568_vm2, %v558_v7  ;;  %v4164_v17 = vld [vmem:[%s5013_s4] ss:$0 sm:$0xff]  ;;  %p3786_p11 = scmp.ne.s32.totalorder %s2898_s21, %s3785_s2  ;;  %s3789_s4 = sshll.u32 %s3851_s3, 4  ;;  %s3790_s4 = int_to_ptr.vmem [resolvable:$false] %s3789_s4 }
  0x2b   : > { %3348 = vmatprep.mubr.msk.f32.mxu1 %vm3848_vm1, %v4996_v1  ;;  %3346 = vmatprep.subr.mxu1 %v4996_v1  ;;  %s3791_s28 = scalar_lea.vmem %s3790_s4, 32  ;;  %p3792_p0 = scmp.lt.s32.totalorder %s2898_s21, %s3790_s4 }
  0x2c   : > { %3347 = vmatpush3.msra.mxu1 %v755_v18  ;;  %3387 = vmatprep.subr.msk.mxu0 %vm805_vm3, %v1043_v19  ;;  %p3787_p12 = pnand %p3786_p11, %p3980_p5  ;;  %p3793_p1 = scmp.lt.s32.totalorder %s3791_s28, %s3785_s2 }
  0x2d   : > { %3310 = vmatmul.mubr.msk.f32.gmra.mxu0 %vm568_vm2, %v548_v8  ;;  %3405 = vmatprep.subr.msk.mxu1 %vm805_vm3, %v1040_v20 }
  0x2e   : > { %3312 = vmatprep.mubr.msk.f32.mxu0 %vm3848_vm1, %v4996_v1  ;;  %3388 = vmatpush3.msk.msra.mxu0 %vm805_vm3, %v1043_v19  ;;  %p3788_p13 = pneg %p3787_p12  ;;  %p3794_p2 = por %p3793_p1, %p3792_p0 }
  0x30   : > { %p3795_p3 = pnand %p3794_p2, %p3788_p13 }
  0x31   : > { %3313 = vmatmul.mubr.msk.f32.gmra.mxu0 %vm568_vm2, %v549_v9 }
  0x32   : > { %3315 = vmatprep.mubr.msk.f32.mxu0 %vm3848_vm1, %v4996_v1 }
  0x35   : > { %3316 = vmatmul.mubr.msk.f32.gmra.mxu0 %vm568_vm2, %v550_v10 }
  0x36   : > { %3318 = vmatprep.mubr.msk.f32.mxu0 %vm3848_vm1, %v4996_v1 }
  0x39   : > { %3319 = vmatmul.mubr.msk.f32.gmra.mxu0 %vm568_vm2, %v551_v11  ;;  %v1042_v11 = vld [vmem:[%s5011_s5 + $0x1c] sm:$0xff] }
  0x3a   : > { %3321 = vmatprep.mubr.msk.f32.mxu0 %vm3848_vm1, %v4996_v1  ;;  %3389 = vmatprep.subr.mxu0 %v1042_v11 }
  0x3b   : > { %3390 = vmatpush3.msra.mxu0 %v1042_v11 }
  0x3d   : > { %3322 = vmatmul.mubr.msk.f32.gmra.mxu0 %vm568_vm2, %v552_v12  ;;  %v1039_v12 = vld [vmem:[%s5011_s5 + $0x8] sm:$0xff] }
  0x3e   : > { %3324 = vmatprep.mubr.msk.f32.mxu0 %vm3848_vm1, %v4996_v1 }
  0x41   : > { %3325 = vmatmul.mubr.msk.f32.gmra.mxu0 %vm568_vm2, %v553_v13  ;;  %v1041_v13 = vld [vmem:[%s5011_s5 + $0x14] sm:$0xff] }
  0x42   : > { %3327 = vmatprep.mubr.msk.f32.mxu0 %vm3848_vm1, %v4996_v1  ;;  %3391 = vmatprep.subr.mxu0 %v1041_v13 }
  0x43   : > { %3392 = vmatpush3.msra.mxu0 %v1041_v13 }
  0x45   : > { %3328 = vmatmul.mubr.msk.f32.gmra.mxu0 %vm568_vm2, %v554_v14  ;;  %v1038_v14 = vld [vmem:[%s5011_s5] sm:$0xff] }
  0x46   : > { %3330 = vmatprep.mubr.msk.f32.mxu0 %vm3848_vm1, %v4996_v1 }
  0x49   : > { %3331 = vmatmul.mubr.msk.f32.gmra.mxu0 %vm568_vm2, %v555_v15  ;;  %v1294_v15 = vld [vmem:[%s5011_s5 + $0x38] sm:$0xf] }
  0x4a   : > { %3333 = vmatprep.mubr.msk.f32.mxu0 %vm3848_vm1, %v4996_v1  ;;  %3423 = vmatprep.subr.msk.mxu0 %vm805_vm3, %v1294_v15 }
  0x4d   : > { %3334 = vmatmul.mubr.msk.f32.gmra.mxu0 %vm568_vm2, %v556_v16  ;;  %v1429_v16 = vld [vmem:[%s5011_s5 + $0x4c] sm:$0xf] }
  0xe5   : > { %v678_v22 = vpop.f32.mrf.mxu0 }
  0xe6   : > { %v679_v23 = vadd.f32 %v4088_v21, %v678_v22  ;;  %v733_v26 = vpop.f32.mrf.mxu1 }
  0xe7   : > { %v3305_v24 = vpop.f32.mrf.mxu0  ;;  %v734_v5 = vadd.f32 %v4088_v21, %v733_v26 }
  0xe8   : > { %v742_v25 = vmax.f32 %v679_v23, 0.0  ;;  %v3338_v29 = vpop.f32.mrf.mxu1 }
  0xe9   : > { %v683_v27 = vpop.f32.mrf.mxu0  ;;  %v753_v8 = vmax.f32 %v734_v5, 0.0 }
  0xea   : > { %v684_v28 = vadd.f32 %v4088_v21, %v683_v27  ;;  %3349 = vmatmul.mubr.msk.f32.vlgmr.msra.gmra.mxu1 %vm765_vm4, %v742_v25  ;;  %v738_v32 = vpop.f32.mrf.mxu1 }
  0xeb   : > { %v3308_v30 = vpop.f32.mrf.mxu0  ;;  %3351 = vmatprep.mubr.msk.f32.mxu1 %vm3848_vm1, %v4996_v1  ;;  %3406 = vmatpush3.msk.msra.mxu1 %vm805_vm3, %v1040_v20  ;;  %v739_v9 = vadd.f32 %v4088_v21, %v738_v32 }
  0xec   : > { %v743_v31 = vmax.f32 %v684_v28, 0.0  ;;  %v3341_v35 = vpop.f32.mrf.mxu1  ;;  %3407 = vmatprep.subr.mxu1 %v1039_v12 }
  0xed   : > { %v688_v33 = vpop.f32.mrf.mxu0  ;;  %v754_v10 = vmax.f32 %v739_v9, 0.0  ;;  %3408 = vmatpush3.msra.mxu1 %v1039_v12 }
  0xee   : > { %v689_v34 = vadd.f32 %v4088_v21, %v688_v33  ;;  %3352 = vmatmul.mubr.msk.f32.gmra.mxu1 %vm765_vm4, %v743_v31  ;;  %3409 = vmatprep.subr.mxu1 %v1038_v14 }
  0xef   : > { %v3311_v36 = vpop.f32.mrf.mxu0  ;;  %3354 = vmatprep.mubr.msk.f32.mxu1 %vm3848_vm1, %v4996_v1  ;;  %3410 = vmatpush3.msra.mxu1 %v1038_v14 }
  0xf0   : > { %v744_v37 = vmax.f32 %v689_v34, 0.0  ;;  %3441 = vmatprep.subr.msk.mxu1 %vm805_vm3, %v1429_v16 }
  0xf1   : > { %v693_v38 = vpop.f32.mrf.mxu0 }
  0xf2   : > { %v694_v39 = vadd.f32 %v4088_v21, %v693_v38  ;;  %3355 = vmatmul.mubr.msk.f32.gmra.mxu1 %vm765_vm4, %v744_v37 }
  0xf3   : > { %v3314_v40 = vpop.f32.mrf.mxu0  ;;  %3357 = vmatprep.mubr.msk.f32.mxu1 %vm3848_vm1, %v4996_v1 }
  0xf4   : > { %v745_v41 = vmax.f32 %v694_v39, 0.0 }
  0xf5   : > { %v698_v42 = vpop.f32.mrf.mxu0 }
  0xf6   : > { %v699_v43 = vadd.f32 %v4088_v21, %v698_v42  ;;  %3358 = vmatmul.mubr.msk.f32.gmra.mxu1 %vm765_vm4, %v745_v41 }
  0xf7   : > { %v3317_v44 = vpop.f32.mrf.mxu0  ;;  %3360 = vmatprep.mubr.msk.f32.mxu1 %vm3848_vm1, %v4996_v1 }
  0xf8   : > { %v746_v45 = vmax.f32 %v699_v43, 0.0  ;;  %v1293_v43 = vld [vmem:[%s5011_s5 + $0x30] sm:$0xff]  ;;  %v1428_v44 = vld [vmem:[%s5011_s5 + $0x44] sm:$0xff] }
  0xf9   : > { %v703_v46 = vpop.f32.mrf.mxu0 }
  0xfa   : > { %v704_v47 = vadd.f32 %v4088_v21, %v703_v46  ;;  %3361 = vmatmul.mubr.msk.f32.gmra.mxu1 %vm765_vm4, %v746_v45 }
  0xfb   : > { %v3320_v48 = vpop.f32.mrf.mxu0  ;;  %3363 = vmatprep.mubr.msk.f32.mxu1 %vm3848_vm1, %v4996_v1 }
  0xfc   : > { %v747_v49 = vmax.f32 %v704_v47, 0.0 }
  0xfd   : > { %v708_v50 = vpop.f32.mrf.mxu0 }
  0xfe   : > { %v709_v51 = vadd.f32 %v4088_v21, %v708_v50  ;;  %3364 = vmatmul.mubr.msk.f32.gmra.mxu1 %vm765_vm4, %v747_v49 }
  0xff   : > { %v3323_v52 = vpop.f32.mrf.mxu0  ;;  %3366 = vmatprep.mubr.msk.f32.mxu1 %vm3848_vm1, %v4996_v1 }
 0x100   : > { %v748_v53 = vmax.f32 %v709_v51, 0.0  ;;  %v1292_v52 = vld [vmem:[%s5011_s5 + $0x28] sm:$0xff] }
 0x101   : > { %v713_v54 = vpop.f32.mrf.mxu0 }
 0x102   : > { %v714_v55 = vadd.f32 %v4088_v21, %v713_v54  ;;  %3367 = vmatmul.mubr.msk.f32.gmra.mxu1 %vm765_vm4, %v748_v53  ;;  %v1427_v53 = vld [vmem:[%s5011_s5 + $0x3c] sm:$0xff] }
 0x103   : > { %v3326_v56 = vpop.f32.mrf.mxu0  ;;  %3369 = vmatprep.mubr.msk.f32.mxu1 %vm3848_vm1, %v4996_v1 }
 0x104   : > { %v749_v57 = vmax.f32 %v714_v55, 0.0 }
 0x105   : > { %v718_v58 = vpop.f32.mrf.mxu0 }
 0x106   : > { %v719_v59 = vadd.f32 %v4088_v21, %v718_v58  ;;  %3370 = vmatmul.mubr.msk.f32.gmra.mxu1 %vm765_vm4, %v749_v57 }
 0x107   : > { %v3329_v60 = vpop.f32.mrf.mxu0  ;;  %3372 = vmatprep.mubr.msk.f32.mxu1 %vm3848_vm1, %v4996_v1 }
 0x108   : > { %v750_v61 = vmax.f32 %v719_v59, 0.0  ;;  %v4237_v59 = vld [vmem:[%s5011_s5 + $0x60] sm:$0xf]  ;;  %v4242_v60 = vld [vmem:[%s5011_s5 + $0x74] sm:$0xf] }
 0x109   : > { %v723_v62 = vpop.f32.mrf.mxu0 }
 0x10a   : > { %v724_v63 = vadd.f32 %v4088_v21, %v723_v62  ;;  %3373 = vmatmul.mubr.msk.f32.gmra.mxu1 %vm765_vm4, %v750_v61 }
 0x10b   : > { %v3332_v0 = vpop.f32.mrf.mxu0  ;;  %3375 = vmatprep.mubr.msk.f32.mxu1 %vm3848_vm1, %v4996_v1 }
 0x10c   : > { %v751_v2 = vmax.f32 %v724_v63, 0.0 }
 0x10d   : > { %v728_v3 = vpop.f32.mrf.mxu0 }
 0x10e   : > { %3376 = vmatmul.mubr.msk.f32.gmra.mxu1 %vm765_vm4, %v751_v2  ;;  %v729_v4 = vadd.f32 %v4088_v21, %v728_v3 }
 0x10f   : > { %3378 = vmatprep.mubr.msk.f32.mxu1 %vm3848_vm1, %v4996_v1  ;;  %v3335_v6 = vpop.f32.mrf.mxu0 }
 0x110   : > { %v752_v7 = vmax.f32 %v729_v4, 0.0 }
 0x112   : > { %3379 = vmatmul.mubr.msk.f32.gmra.mxu1 %vm765_vm4, %v752_v7 }
 0x113   : > { %3381 = vmatprep.mubr.msk.f32.mxu1 %vm3848_vm1, %v4996_v1 }
 0x116   : > { %3382 = vmatmul.mubr.msk.f32.gmra.mxu1 %vm765_vm4, %v753_v8 }
 0x117   : > { %3384 = vmatprep.mubr.msk.f32.mxu1 %vm3848_vm1, %v4996_v1 }
 0x11a   : > { %3385 = vmatmul.mubr.msk.f32.gmra.mxu1 %vm765_vm4, %v754_v10 }
 0x1aa   : > { %v875_v18 = vpop.f32.mrf.mxu1 }
 0x1ab   : > { %v876_v19 = vadd.f32 %v4164_v17, %v875_v18 }
 0x1ac   : > { %v3350_v20 = vpop.f32.mrf.mxu1 }
 0x1ad   : > { %v4167_v21 = vmax.f32 %v876_v19, 0.0 }
 0x1ae   : > { %v880_v22 = vpop.f32.mrf.mxu1 }
 0x1af   : > { %v881_v23 = vadd.f32 %v4164_v17, %v880_v22  ;;  %3411 = vmatprep.mubr.msk.f32.mxu1 %vm765_vm4, %v4167_v21  ;;  %v987_v28 = vrot.slane %v4167_v21, 1 }
 0x1b0   : > { %v3353_v24 = vpop.f32.mrf.mxu1 }
 0x1b1   : > { %v4172_v25 = vmax.f32 %v881_v23, 0.0 }
 0x1b2   : > { %v885_v26 = vpop.f32.mrf.mxu1 }
 0x1b3   : > { %v886_v27 = vadd.f32 %v4164_v17, %v885_v26  ;;  %v988_v30 = vrot.slane %v4172_v25, 1  ;;  %v955_v32 = vrot.slane %v4172_v25, 2  ;;  %v991_v35 = vrot.slane %v4172_v25, 3 }
 0x1b4   : > { %v3356_v29 = vpop.f32.mrf.mxu1 }
 0x1b5   : > { %v4177_v31 = vmax.f32 %v886_v27, 0.0  ;;  %v989_v34 = vsel %vm986_vm5, %v987_v28, %v988_v30 }
 0x1b6   : > { %v890_v33 = vpop.f32.mrf.mxu1  ;;  %3393 = vmatprep.mubr.msk.f32.mxu0 %vm765_vm4, %v989_v34 }
 0x1b7   : > { %v891_v36 = vadd.f32 %v4164_v17, %v890_v33  ;;  %v992_v37 = vrot.slane %v4177_v31, 3  ;;  %v956_v38 = vrot.slane %v4177_v31, 2  ;;  %v995_v46 = vrot.slane %v4177_v31, 5 }
 0x1b8   : > { %v3359_v39 = vpop.f32.mrf.mxu1  ;;  %v959_v49 = vrot.slane %v4177_v31, 4 }
 0x1b9   : > { %v4186_v40 = vmax.f32 %v891_v36, 0.0  ;;  %v4189_v41 = vsel %vm990_vm6, %v991_v35, %v992_v37  ;;  %v4194_v42 = vsel %vm954_vm7, %v955_v32, %v956_v38 }
 0x1ba   : > { %v895_v45 = vpop.f32.mrf.mxu1  ;;  %3394 = vmatmul.mubr.msk.f32.vlgmr.msra.gmra.mxu0 %vm765_vm4, %v4189_v41  ;;  %3412 = vmatmul.mubr.msk.f32.vlgmr.msra.gmra.mxu1 %vm765_vm4, %v4194_v42 }
 0x1bb   : > { %v896_v47 = vadd.f32 %v4164_v17, %v895_v45  ;;  %v996_v48 = vrot.slane %v4186_v40, 5  ;;  %v960_v50 = vrot.slane %v4186_v40, 4  ;;  %3424 = vmatpush3.msk.msra.mxu0 %vm805_vm3, %v1294_v15  ;;  %3442 = vmatpush3.msk.msra.mxu1 %vm805_vm3, %v1429_v16  ;;  %v998_v58 = vrot.slane %v4186_v40, 7 }
 0x1bc   : > { %v3362_v51 = vpop.f32.mrf.mxu1  ;;  %3425 = vmatprep.subr.mxu0 %v1293_v43  ;;  %3443 = vmatprep.subr.mxu1 %v1428_v44  ;;  %v964_v63 = vrot.slane %v4186_v40, 6 }
 0x1bd   : > { %v4219_v54 = vmax.f32 %v896_v47, 0.0  ;;  %v4222_v55 = vsel %vm994_vm8, %v995_v46, %v996_v48  ;;  %v4227_v56 = vsel %vm805_vm3, %v959_v49, %v960_v50  ;;  %3426 = vmatpush3.msra.mxu0 %v1293_v43  ;;  %3444 = vmatpush3.msra.mxu1 %v1428_v44  ;;  %v1021_v51 = vrot.slane %v4167_v21, 2 }
 0x1be   : > { %v900_v57 = vpop.f32.mrf.mxu1  ;;  %3396 = vmatprep.mubr.msk.f32.mxu0 %vm765_vm4, %v4222_v55  ;;  %3414 = vmatprep.mubr.msk.f32.mxu1 %vm765_vm4, %v4227_v56  ;;  %v1023_v21 = vrot.slane %v4172_v25, 4 }
 0x1bf   : > { %v901_v61 = vadd.f32 %v4164_v17, %v900_v57  ;;  %v999_v62 = vrot.slane %v4219_v54, 7  ;;  %v965_v0 = vrot.slane %v4219_v54, 6  ;;  %3427 = vmatprep.subr.mxu0 %v1292_v52  ;;  %3445 = vmatprep.subr.mxu1 %v1427_v53 }
 0x1c0   : > { %v3365_v2 = vpop.f32.mrf.mxu1  ;;  %3428 = vmatpush3.msra.mxu0 %v1292_v52  ;;  %3446 = vmatpush3.msra.mxu1 %v1427_v53 }
 0x1c1   : > { %v4248_v3 = vmax.f32 %v901_v61, 0.0  ;;  %v4251_v4 = vsel %vm608_vm0, %v998_v58, %v999_v62  ;;  %v4256_v5 = vsel %vm963_vm9, %v964_v63, %v965_v0  ;;  %3459 = vmatprep.subr.msk.mxu0 %vm805_vm3, %v4237_v59  ;;  %3477 = vmatprep.subr.msk.mxu1 %vm805_vm3, %v4242_v60  ;;  %v1022_v58 = vsel %vm954_vm7, %v1021_v51, %v955_v32  ;;  %v1549_v32 = vld [vmem:[%s5011_s5 + $0x58] sm:$0xff] }
 0x1c2   : > { %v905_v6 = vpop.f32.mrf.mxu1  ;;  %3397 = vmatmul.mubr.msk.f32.gmra.mxu0 %vm765_vm4, %v4251_v4  ;;  %3415 = vmatmul.mubr.msk.f32.gmra.mxu1 %vm765_vm4, %v4256_v5  ;;  %v1025_v0 = vrot.slane %v4177_v31, 6  ;;  %v1670_v31 = vld [vmem:[%s5011_s5 + $0x6c] sm:$0xff] }
 0x1c3   : > { %v906_v7 = vadd.f32 %v4164_v17, %v905_v6  ;;  %3417 = vmatprep.mubr.msk.f32.mxu1 %vm765_vm4, %v4248_v3  ;;  %v1002_v12 = vrot.slane %v4248_v3, 1  ;;  %v1024_v6 = vsel %vm805_vm3, %v1023_v21, %v959_v49 }
 0x1c4   : > { %v3368_v8 = vpop.f32.mrf.mxu1  ;;  %v4348_v25 = vsel %vm963_vm9, %v1025_v0, %v964_v63  ;;  %v1027_v63 = vrot.slane %v4248_v3, 2 }
 0x1c5   : > { %v4269_v9 = vmax.f32 %v906_v7, 0.0 }
 0x1c6   : > { %v910_v10 = vpop.f32.mrf.mxu1 }
 0x1c7   : > { %v911_v11 = vadd.f32 %v4164_v17, %v910_v10  ;;  %v1003_v13 = vrot.slane %v4269_v9, 1  ;;  %v1005_v19 = vrot.slane %v4269_v9, 3  ;;  %v969_v23 = vrot.slane %v4269_v9, 2 }
 0x1c8   : > { %v3371_v14 = vpop.f32.mrf.mxu1 }
 0x1c9   : > { %v4274_v15 = vmax.f32 %v911_v11, 0.0  ;;  %v4277_v16 = vsel %vm986_vm5, %v1002_v12, %v1003_v13  ;;  %v1669_v12 = vld [vmem:[%s5011_s5 + $0x64] sm:$0xff]  ;;  %v1029_v13 = vrot.slane %v4269_v9, 4 }
 0x1ca   : > { %v915_v18 = vpop.f32.mrf.mxu1  ;;  %3399 = vmatprep.mubr.msk.f32.mxu0 %vm765_vm4, %v4277_v16 }
 0x1cb   : > { %v916_v20 = vadd.f32 %v4164_v17, %v915_v18  ;;  %v1006_v22 = vrot.slane %v4274_v15, 3  ;;  %v970_v24 = vrot.slane %v4274_v15, 2  ;;  %v1008_v33 = vrot.slane %v4274_v15, 5 }
 0x1cc   : > { %v3374_v26 = vpop.f32.mrf.mxu1  ;;  %v973_v36 = vrot.slane %v4274_v15, 4 }
 0x1cd   : > { %v4286_v27 = vmax.f32 %v916_v20, 0.0  ;;  %v4289_v28 = vsel %vm990_vm6, %v1005_v19, %v1006_v22  ;;  %v4292_v29 = vsel %vm954_vm7, %v969_v23, %v970_v24  ;;  %v1031_v19 = vrot.slane %v4274_v15, 6  ;;  %v1792_v24 = vld [vmem:[%s5011_s5 + $0x88] sm:$0xf]  ;;  %v1913_v26 = vld [vmem:[%s5011_s5 + $0x9c] sm:$0xf] }
 0x1ce   : > { %v920_v30 = vpop.f32.mrf.mxu1  ;;  %3400 = vmatmul.mubr.msk.f32.gmra.mxu0 %vm765_vm4, %v4289_v28  ;;  %3418 = vmatmul.mubr.msk.f32.gmra.mxu1 %vm765_vm4, %v4292_v29  ;;  %v4395_v20 = vsel %vm805_vm3, %v1029_v13, %v973_v36 }
 0x1cf   : > { %v921_v34 = vadd.f32 %v4164_v17, %v920_v30  ;;  %v1009_v35 = vrot.slane %v4286_v27, 5  ;;  %v974_v37 = vrot.slane %v4286_v27, 4  ;;  %v1011_v46 = vrot.slane %v4286_v27, 7  ;;  %v1912_v30 = vld [vmem:[%s5011_s5 + $0x94] sm:$0xff] }
 0x1d0   : > { %v3377_v38 = vpop.f32.mrf.mxu1  ;;  %v977_v48 = vrot.slane %v4286_v27, 6  ;;  %v1791_v27 = vld [vmem:[%s5011_s5 + $0x80] sm:$0xff] }
 0x1d1   : > { %v4303_v39 = vmax.f32 %v921_v34, 0.0  ;;  %v4306_v43 = vsel %vm994_vm8, %v1008_v33, %v1009_v35  ;;  %v4309_v44 = vsel %vm805_vm3, %v973_v36, %v974_v37  ;;  %v1911_v33 = vld [vmem:[%s5011_s5 + $0x8c] sm:$0xff] }
 0x1d2   : > { %3402 = vmatprep.mubr.msk.f32.mxu0 %vm765_vm4, %v4306_v43  ;;  %3420 = vmatprep.mubr.msk.f32.mxu1 %vm765_vm4, %v4309_v44  ;;  %v925_v45 = vpop.f32.mrf.mxu1  ;;  %v4410_v15 = vsel %vm963_vm9, %v1031_v19, %v977_v48  ;;  %v2034_v37 = vld [vmem:[%s5011_s5 + $0xb0] sm:$0xf] }
 0x1d3   : > { %v1012_v47 = vrot.slane %v4303_v39, 7  ;;  %v978_v50 = vrot.slane %v4303_v39, 6  ;;  %v926_v11 = vadd.f32 %v4164_v17, %v925_v45 }
 0x1d4   : > { %v3380_v52 = vpop.f32.mrf.mxu1 }
 0x1d5   : > { %v4321_v53 = vsel %vm608_vm0, %v1011_v46, %v1012_v47  ;;  %v4324_v57 = vsel %vm963_vm9, %v977_v48, %v978_v50  ;;  %v2033_v46 = vld [vmem:[%s5011_s5 + $0xa8] sm:$0xff] }
 0x1d6   : > { %3403 = vmatmul.mubr.msk.f32.gmra.mxu0 %vm765_vm4, %v4321_v53  ;;  %3421 = vmatmul.mubr.msk.f32.gmra.mxu1 %vm765_vm4, %v4324_v57  ;;  %v930_v61 = vpop.f32.mrf.mxu1 }
 0x1d7   : > { %3429 = vmatprep.mubr.msk.f32.mxu0 %vm765_vm4, %v1022_v58  ;;  %3447 = vmatprep.mubr.msk.f32.mxu1 %vm765_vm4, %v4194_v42  ;;  %v931_v62 = vadd.f32 %v4164_v17, %v930_v61 }
 0x1d8   : > { %v3383_v2 = vpop.f32.mrf.mxu1 }
 0x1d9   : > { %v4360_v49 = vmax.f32 %v931_v62, 0.0 }
 0x1da   : > { %3430 = vmatmul.mubr.msk.f32.vlgmr.msra.gmra.mxu0 %vm765_vm4, %v1024_v6  ;;  %3448 = vmatmul.mubr.msk.f32.vlgmr.msra.gmra.mxu1 %vm765_vm4, %v4227_v56  ;;  %v935_v42 = vpop.f32.mrf.mxu1 }
 0x1db   : > { %3432 = vmatprep.mubr.msk.f32.mxu0 %vm765_vm4, %v4348_v25  ;;  %3450 = vmatprep.mubr.msk.f32.mxu1 %vm765_vm4, %v4256_v5  ;;  %v936_v40 = vadd.f32 %v4164_v17, %v935_v42  ;;  %v1018_v10 = vrot.slane %v4360_v49, 3  ;;  %v982_v18 = vrot.slane %v4360_v49, 2  ;;  %v1016_v35 = vrot.slane %v4360_v49, 1 }
 0x1dc   : > { %3460 = vmatpush3.msk.msra.mxu0 %vm805_vm3, %v4237_v59  ;;  %3478 = vmatpush3.msk.msra.mxu1 %vm805_vm3, %v4242_v60  ;;  %v3386_v7 = vpop.f32.mrf.mxu1  ;;  %v4376_v59 = vsel %vm954_vm7, %v1027_v63, %v969_v23  ;;  %v1548_v60 = vld [vmem:[%s5011_s5 + $0x50] sm:$0xff]  ;;  %v4403_v23 = vmax.f32 %v926_v11, 0.0 }
 0x1dd   : > { %3461 = vmatprep.subr.mxu0 %v1549_v32  ;;  %3479 = vmatprep.subr.mxu1 %v1670_v31  ;;  %v4368_v8 = vmax.f32 %v936_v40, 0.0 }
 0x1de   : > { %3433 = vmatmul.mubr.msk.f32.gmra.mxu0 %vm765_vm4, %v4219_v54  ;;  %3451 = vmatmul.mubr.msk.f32.gmra.mxu1 %vm765_vm4, %v4248_v3  ;;  %v1015_v34 = vrot.slane %v4403_v23, 1  ;;  %v1033_v36 = vrot.slane %v4403_v23, 2 }
 0x1df   : > { %3435 = vmatprep.mubr.msk.f32.mxu0 %vm765_vm4, %v4376_v59  ;;  %3453 = vmatprep.mubr.msk.f32.mxu1 %vm765_vm4, %v4292_v29  ;;  %v983_v14 = vrot.slane %v4368_v8, 2  ;;  %v1019_v17 = vrot.slane %v4368_v8, 3 }
 0x1e0   : > { %3462 = vmatpush3.msra.mxu0 %v1549_v32  ;;  %3480 = vmatpush3.msra.mxu1 %v1670_v31  ;;  %v1017_v38 = vsel %vm986_vm5, %v1015_v34, %v1016_v35  ;;  %v1034_v45 = vsel %vm954_vm7, %v1033_v36, %v982_v18 }
 0x1e1   : > { %3463 = vmatprep.subr.mxu0 %v1548_v60  ;;  %3481 = vmatprep.subr.mxu1 %v1669_v12  ;;  %v4398_v22 = vsel %vm954_vm7, %v982_v18, %v983_v14  ;;  %v4401_v9 = vsel %vm990_vm6, %v1018_v10, %v1019_v17 }
 0x1e2   : > { %3436 = vmatmul.mubr.msk.f32.gmra.mxu0 %vm765_vm4, %v4395_v20  ;;  %3454 = vmatmul.mubr.msk.f32.gmra.mxu1 %vm765_vm4, %v4309_v44 }
 0x1e3   : > { %3438 = vmatprep.mubr.msk.f32.mxu0 %vm765_vm4, %v4410_v15  ;;  %3456 = vmatprep.mubr.msk.f32.mxu1 %vm765_vm4, %v4324_v57 }
 0x1e4   : > { %3464 = vmatpush3.msra.mxu0 %v1548_v60  ;;  %3482 = vmatpush3.msra.mxu1 %v1669_v12 }
 0x1e5   : > { %3495 = vmatprep.subr.msk.mxu0 %vm805_vm3, %v1792_v24  ;;  %3513 = vmatprep.subr.msk.mxu1 %vm805_vm3, %v1913_v26 }
 0x1e6   : > { %3439 = vmatmul.mubr.msk.f32.gmra.mxu0 %vm765_vm4, %v4303_v39  ;;  %3457 = vmatmul.mubr.msk.f32.gmra.mxu1 %vm765_vm4, %v4403_v23 }
 0x1e7   : > { %3465 = vmatprep.mubr.msk.f32.mxu0 %vm765_vm4, %v4189_v41  ;;  %3483 = vmatprep.mubr.msk.f32.mxu1 %vm765_vm4, %v1024_v6  ;;  %v1790_v41 = vld [vmem:[%s5011_s5 + $0x78] sm:$0xff] }
 0x1ea   : > { %3466 = vmatmul.mubr.msk.f32.vlgmr.msra.gmra.mxu0 %vm765_vm4, %v4222_v55  ;;  %3484 = vmatmul.mubr.msk.f32.vlgmr.msra.gmra.mxu1 %vm765_vm4, %v4348_v25 }
 0x1eb   : > { %3468 = vmatprep.mubr.msk.f32.mxu0 %vm765_vm4, %v4251_v4  ;;  %3486 = vmatprep.mubr.msk.f32.mxu1 %vm765_vm4, %v4219_v54 }
 0x1ec   : > { %3496 = vmatpush3.msk.msra.mxu0 %vm805_vm3, %v1792_v24  ;;  %3514 = vmatpush3.msk.msra.mxu1 %vm805_vm3, %v1913_v26 }
 0x1ed   : > { %3497 = vmatprep.subr.mxu0 %v1791_v27  ;;  %3515 = vmatprep.subr.mxu1 %v1912_v30 }
 0x1ee   : > { %3469 = vmatmul.mubr.msk.f32.gmra.mxu0 %vm765_vm4, %v4277_v16  ;;  %3487 = vmatmul.mubr.msk.f32.gmra.mxu1 %vm765_vm4, %v4376_v59 }
 0x1ef   : > { %3471 = vmatprep.mubr.msk.f32.mxu0 %vm765_vm4, %v4289_v28  ;;  %3489 = vmatprep.mubr.msk.f32.mxu1 %vm765_vm4, %v4395_v20 }
 0x1f0   : > { %3498 = vmatpush3.msra.mxu0 %v1791_v27  ;;  %3516 = vmatpush3.msra.mxu1 %v1912_v30 }
 0x1f1   : > { %3499 = vmatprep.subr.mxu0 %v1790_v41  ;;  %3517 = vmatprep.subr.mxu1 %v1911_v33 }
 0x1f2   : > { %3472 = vmatmul.mubr.msk.f32.gmra.mxu0 %vm765_vm4, %v4306_v43  ;;  %3490 = vmatmul.mubr.msk.f32.gmra.mxu1 %vm765_vm4, %v4410_v15 }
 0x1f3   : > { %3474 = vmatprep.mubr.msk.f32.mxu0 %vm765_vm4, %v4321_v53  ;;  %3492 = vmatprep.mubr.msk.f32.mxu1 %vm765_vm4, %v4303_v39 }
 0x1f4   : > { %3500 = vmatpush3.msra.mxu0 %v1790_v41  ;;  %3518 = vmatpush3.msra.mxu1 %v1911_v33 }
 0x1f5   : > { %3531 = vmatprep.subr.msk.mxu0 %vm805_vm3, %v2034_v37 }
 0x1f6   : > { %3475 = vmatmul.mubr.msk.f32.gmra.mxu0 %vm765_vm4, %v1017_v38  ;;  %3493 = vmatmul.mubr.msk.f32.gmra.mxu1 %vm765_vm4, %v1034_v45 }
 0x1f7   : > { %3501 = vmatprep.mubr.msk.f32.mxu0 %vm765_vm4, %v4227_v56  ;;  %3519 = vmatprep.mubr.msk.f32.mxu1 %vm765_vm4, %v4222_v55  ;;  %v2032_v55 = vld [vmem:[%s5011_s5 + $0xa0] sm:$0xff]  ;;  %v1036_v56 = vrot.slane %v4368_v8, 4 }
 0x1fa   : > { %3502 = vmatmul.mubr.msk.f32.vlgmr.msra.gmra.mxu0 %vm765_vm4, %v4256_v5  ;;  %3520 = vmatmul.mubr.msk.f32.vlgmr.msra.gmra.mxu1 %vm765_vm4, %v4251_v4  ;;  %v2176_v4 = vld [vmem:[%s4982_s7] sm:$0xff]  ;;  %v2275_v5 = vld [vmem:[%s4983_s8 + $0x78] sm:$0xff] }
 0x1fb   : > { %3504 = vmatprep.mubr.msk.f32.mxu0 %vm765_vm4, %v4248_v3  ;;  %3522 = vmatprep.mubr.msk.f32.mxu1 %vm765_vm4, %v4277_v16  ;;  %v1035_v3 = vrot.slane %v4360_v49, 4  ;;  %v2274_v16 = vld [vmem:[%s4983_s8 + $0x70] sm:$0xff] }
 0x1fc   : > { %3532 = vmatpush3.msk.msra.mxu0 %vm805_vm3, %v2034_v37 }
 0x1fd   : > { %3533 = vmatprep.subr.mxu0 %v2033_v46 }
 0x1fe   : > { %3505 = vmatmul.mubr.msk.f32.gmra.mxu0 %vm765_vm4, %v4292_v29  ;;  %3523 = vmatmul.mubr.msk.f32.gmra.mxu1 %vm765_vm4, %v4289_v28  ;;  %v2273_v28 = vld [vmem:[%s4983_s8 + $0x68] sm:$0xff]  ;;  %v2272_v29 = vld [vmem:[%s4983_s8 + $0x60] sm:$0xff] }
 0x1ff   : > { %3507 = vmatprep.mubr.msk.f32.mxu0 %vm765_vm4, %v4309_v44  ;;  %3525 = vmatprep.mubr.msk.f32.mxu1 %vm765_vm4, %v4306_v43  ;;  %v2270_v43 = vld [vmem:[%s4983_s8 + $0x50] sm:$0xff] }
 0x200   : > { %3534 = vmatpush3.msra.mxu0 %v2033_v46 }
 0x201   : > { %3535 = vmatprep.subr.mxu0 %v2032_v55 }
 0x202   : > { %3508 = vmatmul.mubr.msk.f32.gmra.mxu0 %vm765_vm4, %v4324_v57  ;;  %3526 = vmatmul.mubr.msk.f32.gmra.mxu1 %vm765_vm4, %v4321_v53 }
 0x203   : > { %3510 = vmatprep.mubr.msk.f32.mxu0 %vm765_vm4, %v4403_v23  ;;  %3528 = vmatprep.mubr.msk.f32.mxu1 %vm765_vm4, %v1017_v38 }
 0x204   : > { %3536 = vmatpush3.msra.mxu0 %v2032_v55 }
 0x205   : > { %3568 = vmatprep.subr.mxu0 %v4996_v1 }
 0x206   : > { %3511 = vmatmul.mubr.msk.f32.gmra.mxu0 %vm765_vm4, %v4398_v22  ;;  %3529 = vmatmul.mubr.msk.f32.gmra.mxu1 %vm765_vm4, %v4401_v9 }
 0x207   : > { %3537 = vmatprep.mubr.msk.f32.mxu0 %vm765_vm4, %v4348_v25  ;;  %3565 = vmatprep.mubr.msk.f32.mxu1 %vm2178_vm10, %v2176_v4 }
 0x20a   : > { %3538 = vmatmul.mubr.msk.f32.vlgmr.msra.gmra.mxu0 %vm765_vm4, %v4219_v54  ;;  %v1037_v54 = vsel %vm805_vm3, %v1035_v3, %v1036_v56 }
 0x20b   : > { %3540 = vmatprep.mubr.msk.f32.mxu0 %vm765_vm4, %v4376_v59  ;;  %3569 = vmatpush3.msra.mxu0 %v2275_v5 }
 0x20c   : > { %3570 = vmatprep.subr.mxu0 %v4996_v1 }
 0x20d   : > { %3571 = vmatpush3.msra.mxu0 %v2274_v16 }
 0x20e   : > { %3541 = vmatmul.mubr.msk.f32.gmra.mxu0 %vm765_vm4, %v4395_v20  ;;  %3572 = vmatprep.subr.mxu0 %v4996_v1 }
 0x20f   : > { %3543 = vmatprep.mubr.msk.f32.mxu0 %vm765_vm4, %v4410_v15  ;;  %3573 = vmatpush3.msra.mxu0 %v2273_v28 }
 0x210   : > { %3574 = vmatprep.subr.mxu0 %v4996_v1 }
 0x211   : > { %3575 = vmatpush3.msra.mxu0 %v2272_v29 }
 0x212   : > { %3544 = vmatmul.mubr.msk.f32.gmra.mxu0 %vm765_vm4, %v4303_v39  ;;  %3576 = vmatprep.subr.mxu0 %v4996_v1  ;;  %v2271_v39 = vld [vmem:[%s4983_s8 + $0x58] sm:$0xff] }
 0x213   : > { %3546 = vmatprep.mubr.msk.f32.mxu0 %vm765_vm4, %v1034_v45  ;;  %3577 = vmatpush3.msra.mxu0 %v2271_v39 }
 0x214   : > { %3578 = vmatprep.subr.mxu0 %v4996_v1 }
 0x215   : > { %3579 = vmatpush3.msra.mxu0 %v2270_v43 }
 0x216   : > { %3547 = vmatmul.mubr.msk.f32.gmra.mxu0 %vm765_vm4, %v1037_v54  ;;  %3580 = vmatprep.subr.mxu0 %v4996_v1 }
 0x217   : > { %3584 = vmatprep.mubr.msk.f32.mxu0 %vm3848_vm1, %v4996_v1 }
 0x27a   : > { %v4566_v44 = vpop.f32.mrf.mxu0  ;;  %v4568_v47 = vpop.f32.mrf.mxu1 }
 0x27c   : > { %v4570_v48 = vpop.f32.mrf.mxu0  ;;  %v4572_v50 = vpop.f32.mrf.mxu1 }
 0x282   : > { %v3398_v51 = vpop.f32.mrf.mxu0  ;;  %v3416_v52 = vpop.f32.mrf.mxu1 }
 0x284   : > { %v1139_v53 = vpop.f32.mrf.mxu0  ;;  %v1263_v57 = vpop.f32.mrf.mxu1 }
 0x28e   : > { %v3401_v58 = vpop.f32.mrf.mxu0  ;;  %v3419_v61 = vpop.f32.mrf.mxu1 }
 0x28f   : > { %v1279_v4 = vadd.f32 %v3419_v61, %v3401_v58  ;;  %v1259_v58 = vadd.f32 %v4568_v47, %v4566_v44 }
 0x290   : > { %v1149_v21 = vpop.f32.mrf.mxu0  ;;  %v1273_v62 = vpop.f32.mrf.mxu1 }
 0x291   : > { %v1274_v28 = vadd.f32 %v1273_v62, %v1149_v21 }
 0x296   : > { %v3404_v0 = vpop.f32.mrf.mxu0  ;;  %v3422_v2 = vpop.f32.mrf.mxu1 }
 0x297   : > { %v1289_v5 = vadd.f32 %v3422_v2, %v3404_v0 }
 0x298   : > { %v1159_v6 = vpop.f32.mrf.mxu0  ;;  %v1283_v25 = vpop.f32.mrf.mxu1 }
 0x299   : > { %v1284_v29 = vadd.f32 %v1283_v25, %v1159_v6 }
 0x29a   : > { %v4574_v32 = vpop.f32.mrf.mxu0  ;;  %v4576_v31 = vpop.f32.mrf.mxu1 }
 0x29c   : > { %v4578_v42 = vpop.f32.mrf.mxu0  ;;  %v4580_v49 = vpop.f32.mrf.mxu1 }
 0x29e   : > { %v3434_v40 = vpop.f32.mrf.mxu0  ;;  %v4582_v63 = vpop.f32.mrf.mxu1 }
 0x2a0   : > { %v1390_v7 = vpop.f32.mrf.mxu0  ;;  %v4584_v8 = vpop.f32.mrf.mxu1 }
 0x2a2   : > { %v3437_v10 = vpop.f32.mrf.mxu0  ;;  %v3455_v59 = vpop.f32.mrf.mxu1 }
 0x2a3   : > { %v1424_v39 = vadd.f32 %v3437_v10, %v1279_v4 }
 0x2a4   : > { %v1400_v11 = vpop.f32.mrf.mxu0  ;;  %v1521_v60 = vpop.f32.mrf.mxu1 }
 0x2a6   : > { %v3440_v12 = vpop.f32.mrf.mxu0  ;;  %v3458_v13 = vpop.f32.mrf.mxu1 }
 0x2a7   : > { %v1426_v43 = vadd.f32 %v3440_v12, %v1289_v5 }
 0x2a8   : > { %v1410_v14 = vpop.f32.mrf.mxu0  ;;  %v1531_v17 = vpop.f32.mrf.mxu1 }
 0x2aa   : > { %v4586_v18 = vpop.f32.mrf.mxu0  ;;  %v4588_v19 = vpop.f32.mrf.mxu1 }
 0x2ab   : > { %5014 = vst [vmem:[#allocation7_spill] sm:$0xff] %v4588_v19  ;;  %v1264_v19 = vadd.f32 %v1263_v57, %v1139_v53 }
 0x2ac   : > { %v4590_v20 = vpop.f32.mrf.mxu0  ;;  %v4592_v22 = vpop.f32.mrf.mxu1 }
 0x2ad   : > { %5015 = vst [vmem:[#allocation8_spill] sm:$0xff] %v4590_v20  ;;  %5016 = vst [vmem:[#allocation9_spill] sm:$0xff] %v4592_v22  ;;  %v1423_v22 = vadd.f32 %v1400_v11, %v1274_v28  ;;  %v1545_v20 = vadd.f32 %v3455_v59, %v1424_v39  ;;  %v1421_v61 = vadd.f32 %v1390_v7, %v1264_v19 }
 0x2ae   : > { %v3470_v9 = vpop.f32.mrf.mxu0  ;;  %v4594_v23 = vpop.f32.mrf.mxu1 }
 0x2af   : > { %5017 = vst [vmem:[#allocation10_spill] sm:$0xff] %v4594_v23  ;;  %v1547_v23 = vadd.f32 %v3458_v13, %v1426_v43  ;;  %v1544_v62 = vadd.f32 %v1521_v60, %v1423_v22  ;;  %v1542_v47 = vadd.f32 %v4584_v8, %v1421_v61 }
 0x2b0   : > { %v1632_v15 = vpop.f32.mrf.mxu0  ;;  %v4596_v24 = vpop.f32.mrf.mxu1 }
 0x2b1   : > { %5018 = vst [vmem:[#allocation11_spill] sm:$0xff] %v4596_v24 }
 0x2b2   : > { %v3473_v26 = vpop.f32.mrf.mxu0  ;;  %v3491_v27 = vpop.f32.mrf.mxu1 }
 0x2b3   : > { %v1666_v6 = vadd.f32 %v3473_v26, %v1545_v20 }
 0x2b4   : > { %v1642_v30 = vpop.f32.mrf.mxu0  ;;  %v1763_v41 = vpop.f32.mrf.mxu1  ;;  %v5024_v26 = vld [vmem:[#allocation8_spill] sm:$0xff]  ;;  %v5027_v5 = vld [vmem:[#allocation9_spill] sm:$0xff] }
 0x2b5   : > { %v1787_v60 = vadd.f32 %v3491_v27, %v1666_v6 }
 0x2b6   : > { %v3476_v33 = vpop.f32.mrf.mxu0  ;;  %v3494_v34 = vpop.f32.mrf.mxu1  ;;  %v5023_v8 = vld [vmem:[#allocation10_spill] sm:$0xff] }
 0x2b7   : > { %v1668_v25 = vadd.f32 %v3476_v33, %v1547_v23 }
 0x2b8   : > { %v1652_v35 = vpop.f32.mrf.mxu0  ;;  %v1773_v36 = vpop.f32.mrf.mxu1 }
 0x2b9   : > { %v1789_v12 = vadd.f32 %v3494_v34, %v1668_v25 }
 0x2ba   : > { %v4598_v37 = vpop.f32.mrf.mxu0  ;;  %v4600_v38 = vpop.f32.mrf.mxu1 }
 0x2bb   : > { %5019 = vst [vmem:[#allocation12_spill] sm:$0xff] %v4598_v37  ;;  %5020 = vst [vmem:[#allocation13_spill] sm:$0xff] %v4600_v38  ;;  %v1269_v38 = vadd.f32 %v3416_v52, %v3398_v51  ;;  %v1254_v51 = vadd.f32 %v4572_v50, %v4570_v48  ;;  %v1420_v52 = vadd.f32 %v4574_v32, %v1259_v58 }
 0x2bc   : > { %v4602_v45 = vpop.f32.mrf.mxu0  ;;  %v4604_v46 = vpop.f32.mrf.mxu1  ;;  %v1663_v48 = vadd.f32 %v1632_v15, %v1542_v47 }
 0x2bd   : > { %5021 = vst [vmem:[#allocation14_spill] sm:$0xff] %v4602_v45  ;;  %5022 = vst [vmem:[#allocation15_spill] sm:$0xff] %v4604_v46  ;;  %v1425_v45 = vadd.f32 %v1410_v14, %v1284_v29  ;;  %v1422_v24 = vadd.f32 %v3434_v40, %v1269_v38  ;;  %v1665_v40 = vadd.f32 %v1642_v30, %v1544_v62  ;;  %v5025_v30 = vld [vmem:[#allocation11_spill] sm:$0xff]  ;;  %v3068_v29 = vld [vmem:[%s4981_s6] ss:$0 sm:$0xff] }
 0x2be   : > { %v3506_v55 = vpop.f32.mrf.mxu0  ;;  %v4606_v3 = vpop.f32.mrf.mxu1  ;;  %v1419_v44 = vadd.f32 %v4578_v42, %v1254_v51  ;;  %v1541_v13 = vadd.f32 %v4576_v31, %v1420_v52  ;;  %v1784_v31 = vadd.f32 %v5025_v30, %v1663_v48  ;;  %v2511_v30 = vld [vmem:[%s4983_s8 + $0xf8] sm:$0xff] }
 0x2bf   : > { %v1546_v2 = vadd.f32 %v1531_v17, %v1425_v45  ;;  %v1543_v57 = vadd.f32 %v4582_v63, %v1422_v24  ;;  %v1786_v32 = vadd.f32 %v1763_v41, %v1665_v40 }
 0x2c0   : > { %v1874_v56 = vpop.f32.mrf.mxu0  ;;  %v4608_v1 = vpop.f32.mrf.mxu1  ;;  %v1540_v63 = vadd.f32 %v4580_v49, %v1419_v44  ;;  %v1662_v20 = vadd.f32 %v4586_v18, %v1541_v13 }
 0x2c1   : > { %v1667_v10 = vadd.f32 %v1652_v35, %v1546_v2  ;;  %v1664_v11 = vadd.f32 %v3470_v9, %v1543_v57  ;;  %v5026_v35 = vld [vmem:[#allocation7_spill] sm:$0xff] }
 0x2c2   : > { %v3509_v54 = vpop.f32.mrf.mxu0  ;;  %v3527_v0 = vpop.f32.mrf.mxu1  ;;  %v1661_v27 = vadd.f32 %v5024_v26, %v1540_v63  ;;  %v5030_v52 = vld [vmem:[#allocation13_spill] sm:$0xff]  ;;  %v2268_v26 = vld [vmem:[%s4983_s8 + $0x40] sm:$0xff] }
 0x2c3   : > { %v1788_v14 = vadd.f32 %v1773_v36, %v1667_v10  ;;  %v1908_v17 = vadd.f32 %v3509_v54, %v1787_v60  ;;  %v1785_v23 = vadd.f32 %v5023_v8, %v1664_v11  ;;  %v1783_v36 = vadd.f32 %v5026_v35, %v1662_v20  ;;  %v2266_v63 = vld [vmem:[%s4983_s8 + $0x30] sm:$0xff]  ;;  %v2265_v20 = vld [vmem:[%s4983_s8 + $0x28] sm:$0xff] }
 0x2c4   : > { %v1884_v16 = vpop.f32.mrf.mxu0  ;;  %v2005_v7 = vpop.f32.mrf.mxu1  ;;  %v5029_v61 = vld [vmem:[#allocation14_spill] sm:$0xff]  ;;  %v5031_v47 = vld [vmem:[#allocation15_spill] sm:$0xff]  ;;  %v2262_v8 = vld [vmem:[%s4983_s8 + $0x10] sm:$0xff] }
 0x2c5   : > { %v1907_v24 = vadd.f32 %v1884_v16, %v1786_v32  ;;  %v1906_v33 = vadd.f32 %v3506_v55, %v1785_v23  ;;  %v2029_v41 = vadd.f32 %v3527_v0, %v1908_v17  ;;  %v1782_v16 = vadd.f32 %v5027_v5, %v1661_v27  ;;  %v2267_v17 = vld [vmem:[%s4983_s8 + $0x38] sm:$0xff]  ;;  %v2261_v23 = vld [vmem:[%s4983_s8 + $0x8] sm:$0xff] }
 0x2c6   : > { %v3512_v37 = vpop.f32.mrf.mxu0  ;;  %v3530_v42 = vpop.f32.mrf.mxu1  ;;  %v2509_v35 = vld [vmem:[%s4983_s8 + $0xe8] sm:$0xff] }
 0x2c7   : > { %v1910_v19 = vadd.f32 %v3512_v37, %v1789_v12  ;;  %v1905_v37 = vadd.f32 %v1874_v56, %v1784_v31  ;;  %v2028_v18 = vadd.f32 %v2005_v7, %v1907_v24  ;;  %v2027_v39 = vadd.f32 %v4606_v3, %v1906_v33  ;;  %v2269_v24 = vld [vmem:[%s4983_s8 + $0x48] sm:$0xff]  ;;  %v2429_v33 = vld [vmem:[%s4983_s8 + $0xb8] sm:$0xff] }
 0x2c8   : > { %v1894_v46 = vpop.f32.mrf.mxu0  ;;  %v2015_v49 = vpop.f32.mrf.mxu1  ;;  %v1903_v0 = vadd.f32 %v5029_v61, %v1782_v16  ;;  %3581 = vmatpush3.msra.mxu0 %v2269_v24  ;;  %v2423_v5 = vld [vmem:[%s4983_s8 + $0x88] sm:$0xff]  ;;  %v2504_v16 = vld [vmem:[%s4983_s8 + $0xc0] sm:$0xff] }
 0x2c9   : > { %v1909_v9 = vadd.f32 %v1894_v46, %v1788_v14  ;;  %v2031_v34 = vadd.f32 %v3530_v42, %v1910_v19  ;;  %v5028_v46 = vld [vmem:[#allocation12_spill] sm:$0xff]  ;;  %v2026_v62 = vadd.f32 %v4608_v1, %v1905_v37  ;;  %v5032_v19 = vmov 0.0   ;;  %v2264_v42 = vld [vmem:[%s4983_s8 + $0x20] sm:$0xff] }
 0x2ca   : > { %v4612_v21 = vpop.f32.mrf.mxu0  ;;  %v1904_v28 = vadd.f32 %v5028_v46, %v1783_v36  ;;  %v2024_v3 = vadd.f32 %v5031_v47, %v1903_v0  ;;  %3582 = vmatprep.subr.mxu0 %v5032_v19  ;;  %v2427_v36 = vld [vmem:[%s4983_s8 + $0xa8] sm:$0xff]  ;;  %v2508_v37 = vld [vmem:[%s4983_s8 + $0xe0] sm:$0xff] }
 0x2cb   : > { %v2030_v45 = vadd.f32 %v2015_v49, %v1909_v9  ;;  %v2260_v9 = vld [vmem:[%s4983_s8] sm:$0xff]  ;;  %3583 = vmatpush3.msra.mxu0 %v2268_v26  ;;  %v2612_v61 = vld [vmem:[%s4985_s10 + $0x48] sm:$0xff] }
 0x2cc   : > { %v4617_v53 = vpop.f32.mrf.mxu0  ;;  %v2025_v57 = vadd.f32 %v5030_v52, %v1904_v28  ;;  %3606 = vmatprep.subr.mxu0 %v5032_v19  ;;  %v2426_v49 = vld [vmem:[%s4983_s8 + $0xa0] sm:$0xff]  ;;  %v2605_v52 = vld [vmem:[%s4985_s10 + $0x10] sm:$0xff]  ;;  %v2704_v47 = vld [vmem:[%s4987_s12 + $0x68] sm:$0xff] }
 0x2cd   : > { %v2145_v1 = vadd.f32 %v4617_v53, %v2024_v3  ;;  %v2177_v53 = vld [vmem:[%s4982_s7 + $0x8] sm:$0xff]  ;;  %v2422_v28 = vld [vmem:[%s4983_s8 + $0x80] sm:$0xff] }
 0x2ce   : > { %v3542_v59 = vpop.f32.mrf.mxu0  ;;  %v2146_v7 = vadd.f32 %v4612_v21, %v2025_v57  ;;  %v2611_v0 = vld [vmem:[%s4985_s10 + $0x40] sm:$0xff]  ;;  %v2604_v57 = vld [vmem:[%s4985_s10 + $0x8] sm:$0xff] }
 0x2cf   : > { %v2148_v2 = vadd.f32 %v3542_v59, %v2027_v39  ;;  %v2616_v39 = vld [vmem:[%s4985_s10 + $0x68] sm:$0xff]  ;;  %v2703_v3 = vld [vmem:[%s4987_s12 + $0x60] sm:$0xff] }
 0x2d0   : > { %v2116_v50 = vpop.f32.mrf.mxu0  ;;  %v2161_v13 = vadd.f32 %v3068_v29, %v2146_v7  ;;  %v2702_v7 = vld [vmem:[%s4987_s12 + $0x58] sm:$0xff] }
 0x2d1   : > { %v2147_v40 = vadd.f32 %v2116_v50, %v2026_v62  ;;  %v2163_v11 = vadd.f32 %v3068_v29, %v2148_v2  ;;  %v2160_v50 = vadd.f32 %v3068_v29, %v2145_v1  ;;  %v2610_v62 = vld [vmem:[%s4985_s10 + $0x38] sm:$0xff]  ;;  %v2609_v2 = vld [vmem:[%s4985_s10 + $0x30] sm:$0xff]  ;;  %v2699_v1 = vld [vmem:[%s4987_s12 + $0x40] sm:$0xff] }
 0x2d2   : > { %v3545_v22 = vpop.f32.mrf.mxu0  ;;  %v2169_v14 = vmax.f32 %v2161_v13, 0.0  ;;  %v2696_v13 = vld [vmem:[%s4987_s12 + $0x28] sm:$0xff] }
 0x2d3   : > { %v2150_v54 = vadd.f32 %v3545_v22, %v2029_v41  ;;  %v2162_v59 = vadd.f32 %v3068_v29, %v2147_v40  ;;  %v2171_v48 = vmax.f32 %v2163_v11, 0.0  ;;  %v2168_v21 = vmax.f32 %v2160_v50, 0.0  ;;  %v2263_v22 = vld [vmem:[%s4983_s8 + $0x18] sm:$0xff]  ;;  %v2510_v41 = vld [vmem:[%s4983_s8 + $0xf0] sm:$0xff]  ;;  %v2603_v40 = vld [vmem:[%s4985_s10] sm:$0xff] }
 0x2d4   : > { %v2126_v15 = vpop.f32.mrf.mxu0  ;;  %v2701_v11 = vld [vmem:[%s4987_s12 + $0x50] sm:$0xff]  ;;  %v2694_v50 = vld [vmem:[%s4987_s12 + $0x18] sm:$0xff] }
 0x2d5   : > { %v2149_v43 = vadd.f32 %v2126_v15, %v2028_v18  ;;  %v2165_v6 = vadd.f32 %v3068_v29, %v2150_v54  ;;  %v2170_v32 = vmax.f32 %v2162_v59, 0.0  ;;  %v2425_v18 = vld [vmem:[%s4983_s8 + $0x98] sm:$0xff]  ;;  %v2424_v54 = vld [vmem:[%s4983_s8 + $0x90] sm:$0xff] }
 0x2d6   : > { %v3548_v38 = vpop.f32.mrf.mxu0  ;;  %v2698_v59 = vld [vmem:[%s4987_s12 + $0x38] sm:$0xff] }
 0x2d7   : > { %v2152_v4 = vadd.f32 %v3548_v38, %v2031_v34  ;;  %v2164_v10 = vadd.f32 %v3068_v29, %v2149_v43  ;;  %v2173_v60 = vmax.f32 %v2165_v6, 0.0  ;;  %v2428_v34 = vld [vmem:[%s4983_s8 + $0xb0] sm:$0xff]  ;;  %v2507_v38 = vld [vmem:[%s4983_s8 + $0xd8] sm:$0xff]  ;;  %v2615_v43 = vld [vmem:[%s4985_s10 + $0x60] sm:$0xff] }
 0x2d8   : > { %v2136_v55 = vpop.f32.mrf.mxu0  ;;  %v2608_v6 = vld [vmem:[%s4985_s10 + $0x28] sm:$0xff] }
 0x2d9   : > { %v2167_v58 = vadd.f32 %v3068_v29, %v2152_v4  ;;  %v2151_v56 = vadd.f32 %v2136_v55, %v2030_v45  ;;  %v2172_v12 = vmax.f32 %v2164_v10, 0.0  ;;  %v2506_v45 = vld [vmem:[%s4983_s8 + $0xd0] sm:$0xff]  ;;  %v2505_v4 = vld [vmem:[%s4983_s8 + $0xc8] sm:$0xff]  ;;  %v2706_v10 = vld [vmem:[%s4987_s12 + $0x78] sm:$0xff] }
 0x2da   : > { %v2617_v55 = vld [vmem:[%s4985_s10 + $0x70] sm:$0xff] }
 0x2db   : > { %v2175_v25 = vmax.f32 %v2167_v58, 0.0  ;;  %v2166_v51 = vadd.f32 %v3068_v29, %v2151_v56  ;;  %v2618_v29 = vld [vmem:[%s4985_s10 + $0x78] sm:$0xff]  ;;  %v2613_v56 = vld [vmem:[%s4985_s10 + $0x50] sm:$0xff] }
 0x2dc   : > { %v2614_v58 = vld [vmem:[%s4985_s10 + $0x58] sm:$0xff] }
 0x2dd   : > { %v2174_v44 = vmax.f32 %v2166_v51, 0.0  ;;  %3549 = vmatprep.subr.mxu1 %v2175_v25  ;;  %v2606_v51 = vld [vmem:[%s4985_s10 + $0x18] sm:$0xff] }
 0x2de   : > { %3550 = vmatpush3.msra.mxu1 %v2175_v25  ;;  %v2607_v25 = vld [vmem:[%s4985_s10 + $0x20] sm:$0xff] }
 0x2df   : > { %3551 = vmatprep.subr.mxu1 %v2174_v44 }
 0x2e0   : > { %3552 = vmatpush3.msra.mxu1 %v2174_v44  ;;  %v2705_v44 = vld [vmem:[%s4987_s12 + $0x70] sm:$0xff] }
 0x2e1   : > { %3553 = vmatprep.subr.mxu1 %v2173_v60 }
 0x2e2   : > { %3554 = vmatpush3.msra.mxu1 %v2173_v60  ;;  %v2700_v60 = vld [vmem:[%s4987_s12 + $0x48] sm:$0xff] }
 0x2e3   : > { %3555 = vmatprep.subr.mxu1 %v2172_v12 }
 0x2e4   : > { %3556 = vmatpush3.msra.mxu1 %v2172_v12  ;;  %v2697_v12 = vld [vmem:[%s4987_s12 + $0x30] sm:$0xff] }
 0x2e5   : > { %3557 = vmatprep.subr.mxu1 %v2171_v48 }
 0x2e6   : > { %3558 = vmatpush3.msra.mxu1 %v2171_v48  ;;  %v2695_v48 = vld [vmem:[%s4987_s12 + $0x20] sm:$0xff] }
 0x2e7   : > { %3559 = vmatprep.subr.mxu1 %v2170_v32 }
 0x2e8   : > { %3560 = vmatpush3.msra.mxu1 %v2170_v32 }
 0x2e9   : > { %3561 = vmatprep.subr.mxu1 %v2169_v14 }
 0x2ea   : > { %3562 = vmatpush3.msra.mxu1 %v2169_v14 }
 0x2eb   : > { %3563 = vmatprep.subr.mxu1 %v2168_v21 }
 0x2ec   : > { %3564 = vmatpush3.msra.mxu1 %v2168_v21 }
 0x2ed   : > { %3566 = vmatmul.mubr.msk.f32.vlgmr.msra.gmra.mxu1 %vm2178_vm10, %v2177_v53  ;;  %3587 = vmatprep.subr.mxu1 %v5032_v19 }
 0x2ee   : > { %3588 = vmatpush3.msra.mxu1 %v2267_v17  ;;  %3603 = vmatprep.mubr.msk.f32.mxu1 %vm3848_vm1, %v5032_v19 }
 0x2ef   : > { %3589 = vmatprep.subr.mxu1 %v5032_v19 }
 0x2f0   : > { %3590 = vmatpush3.msra.mxu1 %v2266_v63 }
 0x2f1   : > { %3591 = vmatprep.subr.mxu1 %v5032_v19 }
 0x2f2   : > { %3592 = vmatpush3.msra.mxu1 %v2265_v20 }
 0x2f3   : > { %3593 = vmatprep.subr.mxu1 %v5032_v19 }
 0x2f4   : > { %3594 = vmatpush3.msra.mxu1 %v2264_v42 }
 0x2f5   : > { %3595 = vmatprep.subr.mxu1 %v5032_v19 }
 0x2f6   : > { %3596 = vmatpush3.msra.mxu1 %v2263_v22 }
 0x2f7   : > { %3597 = vmatprep.subr.mxu1 %v5032_v19 }
 0x2f8   : > { %3598 = vmatpush3.msra.mxu1 %v2262_v8  ;;  %v3075_v8 = vld [vmem:[%s4984_s9] ss:$0 sm:$0xff] }
 0x2f9   : > { %3599 = vmatprep.subr.mxu1 %v5032_v19 }
 0x2fa   : > { %3600 = vmatpush3.msra.mxu1 %v2261_v23 }
 0x2fb   : > { %3601 = vmatprep.subr.mxu1 %v5032_v19 }
 0x2fc   : > { %3602 = vmatpush3.msra.mxu1 %v2260_v9 }
 0x2fd   : > { %3625 = vmatprep.subr.mxu1 %v5032_v19 }
 0x3ad   : > { %v3567_v27 = vpop.f32.mrf.mxu1 }
 0x3ae   : > { %v2512_v46 = vrot.slane %v3567_v27, 4 }
 0x3af   : > { %v2251_v31 = vpop.f32.mrf.mxu1 }
 0x3b0   : > { %v2277_v15 = vrot.slane %v2251_v31, 4  ;;  %3604 = vmatmul.mubr.msk.f32.vlgmr.msra.gmra.mxu1 %vm2178_vm10, %v2251_v31 }
 0x3b1   : > { %3626 = vmatpush3.msra.mxu1 %v2511_v30  ;;  %3641 = vmatprep.mubr.msk.f32.mxu1 %vm3848_vm1, %v5032_v19 }
 0x3b2   : > { %3627 = vmatprep.subr.mxu1 %v5032_v19  ;;  %3585 = vmatmul.mubr.msk.f32.vlgmr.msra.gmra.mxu0 %vm2178_vm10, %v2277_v15 }
 0x3b3   : > { %3607 = vmatpush3.msra.mxu0 %v2429_v33  ;;  %3628 = vmatpush3.msra.mxu1 %v2510_v41 }
 0x3b4   : > { %3608 = vmatprep.subr.mxu0 %v5032_v19  ;;  %3629 = vmatprep.subr.mxu1 %v5032_v19 }
 0x3b5   : > { %3609 = vmatpush3.msra.mxu0 %v2428_v34  ;;  %3630 = vmatpush3.msra.mxu1 %v2509_v35 }
 0x3b6   : > { %3610 = vmatprep.subr.mxu0 %v5032_v19  ;;  %3631 = vmatprep.subr.mxu1 %v5032_v19 }
 0x3b7   : > { %3611 = vmatpush3.msra.mxu0 %v2427_v36  ;;  %3632 = vmatpush3.msra.mxu1 %v2508_v37  ;;  %v2693_v36 = vld [vmem:[%s4987_s12 + $0x10] sm:$0xff]  ;;  %v2692_v37 = vld [vmem:[%s4987_s12 + $0x8] sm:$0xff] }
 0x3b8   : > { %3612 = vmatprep.subr.mxu0 %v5032_v19  ;;  %3633 = vmatprep.subr.mxu1 %v5032_v19 }
 0x3b9   : > { %3613 = vmatpush3.msra.mxu0 %v2426_v49  ;;  %3634 = vmatpush3.msra.mxu1 %v2507_v38  ;;  %v2691_v49 = vld [vmem:[%s4987_s12] sm:$0xff]  ;;  %v2786_v38 = vld [vmem:[%s4989_s14 + $0x38] sm:$0xff] }
 0x3ba   : > { %3614 = vmatprep.subr.mxu0 %v5032_v19  ;;  %3635 = vmatprep.subr.mxu1 %v5032_v19 }
 0x3bb   : > { %3615 = vmatpush3.msra.mxu0 %v2425_v18  ;;  %3636 = vmatpush3.msra.mxu1 %v2506_v45  ;;  %v2785_v18 = vld [vmem:[%s4989_s14 + $0x30] sm:$0xff]  ;;  %v2784_v45 = vld [vmem:[%s4989_s14 + $0x28] sm:$0xff] }
 0x3bc   : > { %3616 = vmatprep.subr.mxu0 %v5032_v19  ;;  %3637 = vmatprep.subr.mxu1 %v5032_v19 }
 0x3bd   : > { %3617 = vmatpush3.msra.mxu0 %v2424_v54  ;;  %3638 = vmatpush3.msra.mxu1 %v2505_v4  ;;  %v2783_v54 = vld [vmem:[%s4989_s14 + $0x20] sm:$0xff]  ;;  %v2782_v4 = vld [vmem:[%s4989_s14 + $0x18] sm:$0xff] }
 0x3be   : > { %3618 = vmatprep.subr.mxu0 %v5032_v19  ;;  %3639 = vmatprep.subr.mxu1 %v5032_v19 }
 0x3bf   : > { %3619 = vmatpush3.msra.mxu0 %v2423_v5  ;;  %3640 = vmatpush3.msra.mxu1 %v2504_v16  ;;  %v2619_v5 = vld [vmem:[%s4986_s11] sm:$0x1] }
 0x3c0   : > { %3620 = vmatprep.subr.mxu0 %v5032_v19  ;;  %3642 = vmatmul.mubr.msk.f32.vlgmr.msra.gmra.mxu1 %vm2178_vm10, %v2512_v46 }
 0x3c1   : > { %3621 = vmatpush3.msra.mxu0 %v2422_v28  ;;  %3622 = vmatprep.mubr.msk.f32.mxu0 %vm3848_vm1, %v5032_v19 }
 0x3c2   : > { %3623 = vmatmul.mubr.msk.f32.vlgmr.msra.gmra.mxu0 %vm2178_vm10, %v3567_v27  ;;  %3644 = vmatprep.subr.mxu0 %v5032_v19 }
 0x3c3   : > { %3676 = vmatprep.mubr.msk.f32.mxu0 %vm3848_vm1, %v5032_v19  ;;  %3679 = vmatprep.subr.mxu1 %v5032_v19 }
 0x3c4   : > { %3711 = vmatprep.mubr.msk.f32.mxu1 %vm3848_vm1, %v5032_v19  ;;  %3645 = vmatpush3.msra.mxu0 %v2618_v29 }
 0x3c5   : > { %3646 = vmatprep.subr.mxu0 %v5032_v19  ;;  %3680 = vmatpush3.msra.mxu1 %v2706_v10 }
 0x3c6   : > { %3647 = vmatpush3.msra.mxu0 %v2617_v55  ;;  %3681 = vmatprep.subr.mxu1 %v5032_v19  ;;  %v2781_v55 = vld [vmem:[%s4989_s14 + $0x10] sm:$0xff] }
 0x3c7   : > { %3648 = vmatprep.subr.mxu0 %v5032_v19  ;;  %3682 = vmatpush3.msra.mxu1 %v2705_v44 }
 0x3c8   : > { %3649 = vmatpush3.msra.mxu0 %v2616_v39  ;;  %3683 = vmatprep.subr.mxu1 %v5032_v19  ;;  %v2780_v39 = vld [vmem:[%s4989_s14 + $0x8] sm:$0xff] }
 0x3c9   : > { %3650 = vmatprep.subr.mxu0 %v5032_v19  ;;  %3684 = vmatpush3.msra.mxu1 %v2704_v47 }
 0x3ca   : > { %3651 = vmatpush3.msra.mxu0 %v2615_v43  ;;  %3685 = vmatprep.subr.mxu1 %v5032_v19  ;;  %v2779_v43 = vld [vmem:[%s4989_s14] sm:$0xff] }
 0x3cb   : > { %3652 = vmatprep.subr.mxu0 %v5032_v19  ;;  %3686 = vmatpush3.msra.mxu1 %v2703_v3 }
 0x3cc   : > { %3653 = vmatpush3.msra.mxu0 %v2614_v58  ;;  %3687 = vmatprep.subr.mxu1 %v5032_v19  ;;  %v2861_v58 = vld [vmem:[%s4991_s16] sm:$0x1] }
 0x3cd   : > { %3654 = vmatprep.subr.mxu0 %v5032_v19  ;;  %3688 = vmatpush3.msra.mxu1 %v2702_v7 }
 0x3ce   : > { %3655 = vmatpush3.msra.mxu0 %v2613_v56  ;;  %3689 = vmatprep.subr.mxu1 %v5032_v19  ;;  %v3849_v56 = vmov 0  }
 0x3cf   : > { %3656 = vmatprep.subr.mxu0 %v5032_v19  ;;  %3690 = vmatpush3.msra.mxu1 %v2701_v11 }
 0x3d0   : > { %3657 = vmatpush3.msra.mxu0 %v2612_v61  ;;  %3691 = vmatprep.subr.mxu1 %v5032_v19  ;;  %v3850_v61 = vmov 1  }
 0x3d1   : > { %3658 = vmatprep.subr.mxu0 %v5032_v19  ;;  %3692 = vmatpush3.msra.mxu1 %v2700_v60 }
 0x3d2   : > { %3659 = vmatpush3.msra.mxu0 %v2611_v0  ;;  %3693 = vmatprep.subr.mxu1 %v5032_v19 }
 0x3d3   : > { %3660 = vmatprep.subr.mxu0 %v5032_v19  ;;  %3694 = vmatpush3.msra.mxu1 %v2699_v1 }
 0x3d4   : > { %3661 = vmatpush3.msra.mxu0 %v2610_v62  ;;  %3695 = vmatprep.subr.mxu1 %v5032_v19 }
 0x3d5   : > { %3662 = vmatprep.subr.mxu0 %v5032_v19  ;;  %3696 = vmatpush3.msra.mxu1 %v2698_v59 }
 0x3d6   : > { %3663 = vmatpush3.msra.mxu0 %v2609_v2  ;;  %3697 = vmatprep.subr.mxu1 %v5032_v19 }
 0x3d7   : > { %3664 = vmatprep.subr.mxu0 %v5032_v19  ;;  %3698 = vmatpush3.msra.mxu1 %v2697_v12 }
 0x3d8   : > { %3665 = vmatpush3.msra.mxu0 %v2608_v6  ;;  %3699 = vmatprep.subr.mxu1 %v5032_v19 }
 0x3d9   : > { %3666 = vmatprep.subr.mxu0 %v5032_v19  ;;  %3700 = vmatpush3.msra.mxu1 %v2696_v13 }
 0x3da   : > { %3667 = vmatpush3.msra.mxu0 %v2607_v25  ;;  %3701 = vmatprep.subr.mxu1 %v5032_v19  ;;  %v2787_v25 = vld [vmem:[%s4990_s15] sm:$0x1] }
 0x3db   : > { %3668 = vmatprep.subr.mxu0 %v5032_v19  ;;  %3702 = vmatpush3.msra.mxu1 %v2695_v48 }
 0x3dc   : > { %3669 = vmatpush3.msra.mxu0 %v2606_v51  ;;  %3703 = vmatprep.subr.mxu1 %v5032_v19 }
 0x3dd   : > { %3670 = vmatprep.subr.mxu0 %v5032_v19  ;;  %3704 = vmatpush3.msra.mxu1 %v2694_v50 }
 0x3de   : > { %3671 = vmatpush3.msra.mxu0 %v2605_v52  ;;  %3705 = vmatprep.subr.mxu1 %v5032_v19 }
 0x3df   : > { %3672 = vmatprep.subr.mxu0 %v5032_v19  ;;  %3706 = vmatpush3.msra.mxu1 %v2693_v36 }
 0x3e0   : > { %3673 = vmatpush3.msra.mxu0 %v2604_v57  ;;  %3707 = vmatprep.subr.mxu1 %v5032_v19 }
 0x3e1   : > { %3674 = vmatprep.subr.mxu0 %v5032_v19  ;;  %3708 = vmatpush3.msra.mxu1 %v2692_v37 }
 0x3e2   : > { %3675 = vmatpush3.msra.mxu0 %v2603_v40  ;;  %3709 = vmatprep.subr.mxu1 %v5032_v19  ;;  %v2868_v40 = vlaneseq }
 0x3e3   : > { %3714 = vmatprep.subr.mxu0 %v5032_v19  ;;  %3710 = vmatpush3.msra.mxu1 %v2691_v49 }
 0x3e4   : > { %3781 = vset.pattern.permute.xlu0 %v3849_v56  ;;  %v2869_v44 = vshrl.u32 %v2868_v40, 7 }
 0x3e5   : > { %2865 = vperm.xlu0 %3781, %v2861_v58  }
 0x3e6   : > { %v2870_v47 = vsub.s32 0, %v2869_v44 }
 0x3e9   : > { %3782 = vset.pattern.permute.xlu0 %v3850_v61 }
 0x3ea   : > { %2874 = vperm.xlu0 %3782, %v2861_v58  }
 0x460   : > { %v2866_v10 = vpop.permute.xlu0 %2865 }
 0x461   : > { %v2871_v7 = vrot.slane %v2866_v10, %v2870_v47 }
 0x465   : > { %v2875_v3 = vpop.permute.xlu0 %2874 }
 0x466   : > { %v2880_v11 = vrot.slane %v2875_v3, %v2870_v47 }
 0x470   : > { %v2418_v32 = vpop.f32.mrf.mxu1 }
 0x472   : > { %v2346_v14 = vpop.f32.mrf.mxu0  ;;  %v3605_v21 = vpop.f32.mrf.mxu1 }
 0x473   : > { %v2419_v63 = vadd.f32 %v2418_v32, %v2346_v14 }
 0x474   : > { %v3586_v53 = vpop.f32.mrf.mxu0 }
 0x480   : > { %v2581_v17 = vpop.f32.mrf.mxu1 }
 0x482   : > { %v2499_v20 = vpop.f32.mrf.mxu0  ;;  %v3643_v42 = vpop.f32.mrf.mxu1 }
 0x483   : > { %v2503_v22 = vadd.f32 %v2499_v20, %v2419_v63 }
 0x484   : > { %v3624_v23 = vpop.f32.mrf.mxu0 }
 0x485   : > { %v2585_v24 = vadd.f32 %v2581_v17, %v2503_v22 }
 0x487   : > { %v2593_v9 = vadd.f32 %v3075_v8, %v2585_v24 }
 0x489   : > { %v2594_v26 = vmax.f32 %v2593_v9, 0.0 }
 0x48b   : > { %v2595_v27 = vsel %vm805_vm3, %v2594_v26, 0.0 }
 0x48c   : > { %v2596_v30 = vrot.slane %v2595_v27, 4 }
 0x48e   : > { %v2597_v31 = vadd.f32 %v2596_v30, %v2595_v27 }
 0x490   : > { %v2598_v15 = vrot.slane %v2597_v31, 2 }
 0x492   : > { %v2599_v33 = vadd.f32 %v2598_v15, %v2597_v31 }
 0x494   : > { %v2600_v41 = vrot.slane %v2599_v33, 1 }
 0x496   : > { %v2601_v34 = vadd.f32 %v2600_v41, %v2599_v33 }
 0x498   : > { %v2602_v35 = vmul.f32 0.25, %v2601_v34 }
 0x49a   : > { %3677 = vmatmul.mubr.f32.vlgmr.msra.gmra.mxu0 %v2602_v35 }
 0x49b   : > { %3730 = vmatprep.mubr.msk.f32.mxu0 %vm3848_vm1, %v5032_v19  ;;  %3715 = vmatpush3.msra.mxu0 %v2786_v38 }
 0x49c   : > { %3716 = vmatprep.subr.mxu0 %v5032_v19 }
 0x49d   : > { %3717 = vmatpush3.msra.mxu0 %v2785_v18 }
 0x49e   : > { %3718 = vmatprep.subr.mxu0 %v5032_v19 }
 0x49f   : > { %3719 = vmatpush3.msra.mxu0 %v2784_v45 }
 0x4a0   : > { %3720 = vmatprep.subr.mxu0 %v5032_v19 }
 0x4a1   : > { %3721 = vmatpush3.msra.mxu0 %v2783_v54 }
 0x4a2   : > { %3722 = vmatprep.subr.mxu0 %v5032_v19 }
 0x4a3   : > { %3723 = vmatpush3.msra.mxu0 %v2782_v4 }
 0x4a4   : > { %3724 = vmatprep.subr.mxu0 %v5032_v19 }
 0x4a5   : > { %3725 = vmatpush3.msra.mxu0 %v2781_v55 }
 0x4a6   : > { %3726 = vmatprep.subr.mxu0 %v5032_v19 }
 0x4a7   : > { %3727 = vmatpush3.msra.mxu0 %v2780_v39 }
 0x4a8   : > { %3728 = vmatprep.subr.mxu0 %v5032_v19  ;;  %v2707_v19 = vld [vmem:[%s4988_s13] sm:$0x1] }
 0x4a9   : > { %3729 = vmatpush3.msra.mxu0 %v2779_v43 }
 0x55a   : > { %v2686_v16 = vpop.f32.mrf.mxu0 }
 0x55b   : > { %v2687_v46 = vadd.f32 %v2686_v16, %v2619_v5 }
 0x55c   : > { %v3678_v28 = vpop.f32.mrf.mxu0 }
 0x55d   : > { %v2690_v29 = vmax.f32 %v2687_v46, 0.0 }
 0x55f   : > { %3712 = vmatmul.mubr.f32.vlgmr.msra.gmra.mxu1 %v2690_v29 }
 0x61f   : > { %v2774_v0 = vpop.f32.mrf.mxu1 }
 0x620   : > { %v2775_v62 = vadd.f32 %v2774_v0, %v2707_v19 }
 0x621   : > { %v3713_v2 = vpop.f32.mrf.mxu1 }
 0x622   : > { %v2778_v6 = vmax.f32 %v2775_v62, 0.0 }
 0x624   : > { %3731 = vmatmul.mubr.msk.f32.vlgmr.msra.gmra.mxu0 %vm2178_vm10, %v2778_v6 }
 0x6e4   : > { %v2857_v51 = vpop.f32.mrf.mxu0 }
 0x6e5   : > { %v2858_v52 = vadd.f32 %v2857_v51, %v2787_v25 }
 0x6e6   : > { %v3732_v57 = vpop.f32.mrf.mxu0 }
 0x6e7   : > { %3783 = vtanh.f32 %v2858_v52 }
 0x6f4   : > { %v3784_v60 = vpop.eup %3783 }
 0x6f5   : > { %v2872_v1 = vmul.f32 %v3784_v60, %v2871_v7 }
 0x6f7   : > { %v2881_v59 = vadd.f32 %v2880_v11, %v2872_v1 }
 0x6f9   : > { %2883 = vst.msk [vmem:[%s540_s19] sm:$0x1] %vm2882_vm11, %v2881_v59 }
 0x6fa   : > { %3798 = shalt.err (!%p3795_p3)
}
 0x6fb   : > { %s3799_s5 = scalar_lea.hbm %s2895_s29, 16  ;;  %s3803_s19 = scalar_lea.hbm %s4992_s17, 32 }
 0x6fc   : > { %p3800_p4 = scmp.ne.s32.totalorder %s2895_s29, %s3799_s5  ;;  %p3804_p9 = scmp.lt.s32.totalorder %s2895_s29, %s4992_s17 }
 0x6fd   : > { %p3805_p10 = scmp.lt.s32.totalorder %s3803_s19, %s3799_s5 }
 0x6fe   : > { %p3801_p7 = pnand %p3800_p4, %p3980_p5 }
 0x6ff   : > { %p3806_p11 = por %p3805_p10, %p3804_p9 }
 0x700   : > { %p3802_p8 = pneg %p3801_p7 }
 0x702   : > { %p3807_p12 = pnand %p3806_p11, %p3802_p8 }
 0x704   : > { %3810 = shalt.err (!%p3807_p12)
}
 0x705   : > { %3738 = dma.vmem_to_hbm [thread:$0]  (%p3980_p5), %s2898_s21, 16, %s2895_s29, %s2885_s30  }
 0x706 PF: > { %p3744_p13 = scmp.ge.s32.totalorder %s3845_s27, 2  ;;  %s2909_s2 = sand.u32 1, %s3833_s24  }
 0x707   : > { %s2910_s3 = scalar_lea.sflag [#allocation3], %s2909_s2 }
 0x708   : > { %p3741_p0 = pnand %p3744_p13, %p3984_p6 }
 0x70a   : > { %p3742_p1 = pneg %p3741_p0 }
 0x70c   : > { %3828 = dma.done.wait (%p3742_p1), %s2910_s3, 16  }
 0x70d   : > { %3830 = vsyncadd (%p3742_p1), %s2910_s3, 4294967280  ;;  %s5033_s4 = sld [smem:[#allocation5_spill]]  ;;  %p27_p2 = scmp.ge.s32.totalorder %s3967_s0, 4  }
 0x70e   : > { %s5034_s26 = sld [smem:[#allocation6_spill]]  ;;  %s5035_s24 = smov %s3837_s25 }
 0x70f   : > { %s5037_s27 = smov %s3967_s0  ;;  %29 = sbr.rel (!%p27_p2) target bundleno = 10 (0xa), region = 123 }
 0x713   : > { %s5036_s25 = smov %s5033_s4 }
 0x714   :  { %2914 = vsyncpa [#allocation3], 1 }
 0x715   :  { %2916 = vsyncpa [#allocation3 + $0x1], 1 }

</bundles_post_ra>
